<compile_context>
chip_gen: v6e
topology: v6e:2x2x1
jax: 0.10.0
libtpu: 0.0.40
codegen_flags: <defaults>
</compile_context>

<pallas_src>
import functools

import jax
import jax.numpy as jnp
from jax.experimental import pallas as pl
from jax.experimental.pallas import tpu as pltpu

_VMEM_LIMIT = 32 * 1024 * 1024        # fits every generation (v7x has 64 MiB)
_MAX_W_TILE_BYTES = 4 * 1024 * 1024   # cap per weight tile (bf16 bytes)
_MAX_ROW_BLOCK = 8                    # output rows per conv grid step


def _largest_divisor(n, cap):
    for d in range(min(n, cap), 0, -1):
        if n % d == 0:
            return d
    return 1


# ----------------------------------------------------------------------------
# Conv (valid padding) + optional fused ReLU.  bf16 MXU, f32 accumulation.
# ----------------------------------------------------------------------------
def _conv_kernel(x_ref, w_ref, b_ref, o_ref, *, kh, kw, wo, th, relu):
    # x_ref: (1, H, W, Cin)     bf16  full image of one batch element (resident)
    # w_ref: (kh, kw*Cin, TCo)  bf16  one Cout tile, kw taps folded into K
    # b_ref: (1, TCo)           f32
    # o_ref: (1, TH, Wo, TCo)
    h0 = pl.program_id(2) * th
    bias = b_ref[...]                                      # (1, TCo) f32
    tco = o_ref.shape[-1]
    for r in range(th):                                    # static unroll
        acc = jnp.zeros((wo, tco), jnp.float32)
        for i in range(kh):
            # Fold the kw taps into the contraction dim: lhs is (Wo, kw*Cin).
            lhs = jnp.concatenate(
                [x_ref[0, h0 + r + i, pl.ds(j, wo), :] for j in range(kw)],
                axis=-1)
            acc = acc + jnp.dot(lhs, w_ref[i],
                                preferred_element_type=jnp.float32)
        acc = acc + bias
        if relu:
            acc = jnp.maximum(acc, 0.0)
        o_ref[0, r] = acc.astype(o_ref.dtype)


def conv2d(x, w, b, relu, out_dtype=jnp.bfloat16):
    """Unpadded ("valid") conv.  x: NHWC, w: HWIO, b: (Cout,)."""
    x = x.astype(jnp.bfloat16)
    w = w.astype(jnp.bfloat16)
    b = b.astype(jnp.float32)
    n, h, wdim, cin = x.shape
    kh, kw, _, cout = w.shape
    ho, wo = h - kh + 1, wdim - kw + 1

    # Cout tile: keep each weight tile under ~4 MiB so double-buffering fits
    # comfortably in scoped VMEM on every TPU generation (incl. v7x 64 MiB).
    tco = cout
    while tco > 128 and kh * kw * cin * tco * 2 > _MAX_W_TILE_BYTES:
        tco //= 2
    assert cout % tco == 0

    th = _largest_divisor(ho, _MAX_ROW_BLOCK)   # rows per grid step

    wf = w.reshape(kh, kw * cin, cout)
    bf = b.reshape(1, cout)
    kern = functools.partial(_conv_kernel, kh=kh, kw=kw, wo=wo, th=th, relu=relu)
    return pl.pallas_call(
        kern,
        out_shape=jax.ShapeDtypeStruct((n, ho, wo, cout), out_dtype),
        grid=(n, cout // tco, ho // th),
        in_specs=[
            pl.BlockSpec((1, h, wdim, cin), lambda b_, c_, r_: (b_, 0, 0, 0)),
            pl.BlockSpec((kh, kw * cin, tco), lambda b_, c_, r_: (0, 0, c_)),
            pl.BlockSpec((1, tco), lambda b_, c_, r_: (0, c_)),
        ],
        out_specs=pl.BlockSpec((1, th, wo, tco),
                               lambda b_, c_, r_: (b_, r_, 0, c_)),
        compiler_params=pltpu.CompilerParams(
            dimension_semantics=("parallel", "parallel", "parallel"),
            vmem_limit_bytes=_VMEM_LIMIT),
    )(x, wf, bf)


# ----------------------------------------------------------------------------
# 2x2 max pool (stride 2): whole image per grid step, no strided ref access.
# ----------------------------------------------------------------------------
def _maxpool_kernel(x_ref, o_ref):
    # x_ref: (1, Ho, 2, Wo, 2*C)   o_ref: (1, Ho, Wo, C)
    a = x_ref[0, :, 0]                      # (Ho, Wo, 2C)  row q=0 of each pair
    b = x_ref[0, :, 1]                      # (Ho, Wo, 2C)  row q=1
    m = jnp.maximum(a, b)                   # max over the H-direction pair
    c = o_ref.shape[-1]
    o_ref[0] = jnp.maximum(m[..., :c], m[..., c:])   # max over the W pair


def maxpool2x2(x):
    n, h, w, c = x.shape
    ho, wo = h // 2, w // 2
    # Pure row-major reshape done by XLA: (n,h,w,c) -> (n,ho,2,wo,2c); element
    # (q,p) of each 2x2 window lives at [:, :, q, :, p*c:(p+1)*c].
    xr = x.reshape(n, ho, 2, wo, 2 * c)
    return pl.pallas_call(
        _maxpool_kernel,
        out_shape=jax.ShapeDtypeStruct((n, ho, wo, c), x.dtype),
        grid=(n,),
        in_specs=[pl.BlockSpec((1, ho, 2, wo, 2 * c),
                               lambda b_: (b_, 0, 0, 0, 0))],
        out_specs=pl.BlockSpec((1, ho, wo, c), lambda b_: (b_, 0, 0, 0)),
        compiler_params=pltpu.CompilerParams(
            dimension_semantics=("parallel",),
            vmem_limit_bytes=_VMEM_LIMIT),
    )(xr)


# ----------------------------------------------------------------------------
# Bilinear x2 upsample, align_corners=True (matches the module's nn.Upsample).
# Plain-JAX glue; tensors here are only ever 4x4 -> 8x8.
# ----------------------------------------------------------------------------
def upsample_bilinear_x2(x):
    n, h, w, c = x.shape
    orig_dtype = x.dtype
    x = x.astype(jnp.float32)

    def coords(size_in, size_out):
        if size_in == 1:
            z = jnp.zeros((size_out,), jnp.int32)
            return z, z, jnp.zeros((size_out,), jnp.float32)
        pos = jnp.arange(size_out, dtype=jnp.float32) * (size_in - 1) / (size_out - 1)
        lo = jnp.clip(jnp.floor(pos).astype(jnp.int32), 0, size_in - 2)
        frac = pos - lo.astype(jnp.float32)
        return lo, lo + 1, frac

    i0, i1, fh = coords(h, 2 * h)
    x = x[:, i0] * (1.0 - fh)[None, :, None, None] + x[:, i1] * fh[None, :, None, None]
    j0, j1, fw = coords(w, 2 * w)
    x = x[:, :, j0] * (1.0 - fw)[None, None, :, None] + x[:, :, j1] * fw[None, None, :, None]
    return x.astype(orig_dtype)


# ----------------------------------------------------------------------------
# Parameters + forward
# ----------------------------------------------------------------------------
_CHANNEL_SPECS = {
    "down1": (3, 64), "down2": (64, 128), "down3": (128, 256),
    "down4": (256, 512), "conv5": (512, 1024),
    "up4": (512 + 1024, 512), "up3": (256 + 512, 256),
    "up2": (128 + 256, 128), "up1": (128 + 64, 64),
}


def _init_conv(key, kh, kw, cin, cout):
    scale = (2.0 / (kh * kw * cin)) ** 0.5
    w = (jax.random.normal(key, (kh, kw, cin, cout), jnp.float32) * scale)
    return w.astype(jnp.bfloat16), jnp.zeros((cout,), jnp.float32)


def init_unet_params(key, n_class):
    params = {}
    keys = jax.random.split(key, 2 * len(_CHANNEL_SPECS) + 1)
    ki = 0
    for name, (cin, cout) in _CHANNEL_SPECS.items():
        params[name] = (_init_conv(keys[ki], 3, 3, cin, cout),
                        _init_conv(keys[ki + 1], 3, 3, cout, cout))
        ki += 2
    params["last"] = _init_conv(keys[ki], 1, 1, 64, n_class)
    return params


def _double_conv(x, p):
    (w1, b1), (w2, b2) = p
    x = conv2d(x, w1, b1, relu=True)
    return conv2d(x, w2, b2, relu=True)


def unet_forward(x_nchw, params):
    x = jnp.transpose(x_nchw, (0, 2, 3, 1)).astype(jnp.bfloat16)  # NCHW -> NHWC
    c1 = _double_conv(x, params["down1"])
    c2 = _double_conv(maxpool2x2(c1), params["down2"])
    c3 = _double_conv(maxpool2x2(c2), params["down3"])
    c4 = _double_conv(maxpool2x2(c3), params["down4"])
    x = _double_conv(maxpool2x2(c4), params["conv5"])

    # Fixed skip-crop offsets exactly as hard-coded in the PyTorch forward.
    for skip, off, name in ((c4, 4, "up4"), (c3, 16, "up3"),
                            (c2, 40, "up2"), (c1, 88, "up1")):
        x = upsample_bilinear_x2(x)
        uh, uw = x.shape[1], x.shape[2]
        x = jnp.concatenate([x, skip[:, off:off + uh, off:off + uw, :]], axis=-1)
        x = _double_conv(x, params[name])

    wl, bl = params["last"]
    out = conv2d(x, wl, bl, relu=False, out_dtype=jnp.float32)   # 1x1, no ReLU
    return jnp.transpose(out, (0, 3, 1, 2))                      # NHWC -> NCHW


# ----------------------------------------------------------------------------
# Small numerical self-check of the Pallas kernels against XLA references
# ----------------------------------------------------------------------------
def _self_check():
    k = jax.random.PRNGKey(42)
    kx, kw_ = jax.random.split(k)
    x = jax.random.normal(kx, (2, 10, 12, 8), jnp.float32).astype(jnp.bfloat16)
    w = (jax.random.normal(kw_, (3, 3, 8, 16), jnp.float32) * 0.1).astype(jnp.bfloat16)
    b = jnp.linspace(-1.0, 1.0, 16).astype(jnp.float32)

    got = conv2d(x, w, b, relu=True, out_dtype=jnp.float32)
    ref = jax.lax.conv_general_dilated(
        x.astype(jnp.float32), w.astype(jnp.float32), (1, 1), "VALID",
        dimension_numbers=("NHWC", "HWIO", "NHWC")) + b
    ref = jnp.maximum(ref, 0.0)
    assert jnp.allclose(got, ref, atol=2e-2, rtol=2e-2), "conv mismatch"

    pooled = maxpool2x2(x)
    pref = jnp.max(x.reshape(2, 5, 2, 6, 2, 8), axis=(2, 4))
    assert jnp.array_equal(pooled, pref), "maxpool mismatch"


if __name__ == "__main__":
    _self_check()
    n_class = 2
    params = init_unet_params(jax.random.PRNGKey(1), n_class)
    # The hard-coded crops (4/16/40/88) in the reference forward imply the
    # classic valid-conv UNet geometry; H = W = 188 is the smallest spatial
    # size for which every crop/concat is valid (final output spatial is 4x4).
    x = jax.random.normal(jax.random.PRNGKey(0), (1, 3, 188, 188), jnp.float32)
    out = jax.block_until_ready(unet_forward(x, params))
    assert out.shape == (1, n_class, 4, 4), out.shape
    assert bool(jnp.all(jnp.isfinite(out)))
    print("KERNEL_OK")
</pallas_src>

<mosaic_0001>
module attributes {stable_mosaic.version = 11 : i64} {
  func.func @_conv_kernel(%arg0: i32, %arg1: i32, %arg2: i32, %arg3: memref<1x10x12x8xbf16, #tpu.memory_space<vmem>>, %arg4: memref<3x24x16xbf16, #tpu.memory_space<vmem>>, %arg5: memref<1x16xf32, #tpu.memory_space<vmem>>, %arg6: memref<1x8x10x16xf32, #tpu.memory_space<vmem>>) attributes {dimension_semantics = [#tpu.dimension_semantics<parallel>, #tpu.dimension_semantics<parallel>, #tpu.dimension_semantics<parallel>], iteration_bounds = array<i64: 2, 1, 1>, scalar_prefetch = 0 : i64, scratch_operands = 0 : i64, tpu.core_type = #tpu.core_type<tc>, window_params = [{transform_indices = @transform_0, window_bounds = array<i64: 1, 10, 12, 8>}, {transform_indices = @transform_1, window_bounds = array<i64: 3, 24, 16>}, {transform_indices = @transform_2, window_bounds = array<i64: 1, 16>}, {transform_indices = @transform_3, window_bounds = array<i64: 1, 8, 10, 16>}]} {
    %c8_i32 = arith.constant 8 : i32
    %0 = arith.muli %arg2, %c8_i32 : i32
    %c0 = arith.constant 0 : index
    %c0_0 = arith.constant 0 : index
    %1 = vector.load %arg5[%c0, %c0_0] : memref<1x16xf32, #tpu.memory_space<vmem>>, vector<1x16xf32>
    %cst = arith.constant 0.000000e+00 : f32
    %2 = vector.broadcast %cst : f32 to vector<10x16xf32>
    %c0_i32 = arith.constant 0 : i32
    %3 = arith.addi %0, %c0_i32 : i32
    %c0_i32_1 = arith.constant 0 : i32
    %4 = arith.addi %3, %c0_i32_1 : i32
    %c0_2 = arith.constant 0 : index
    %5 = arith.index_cast %4 : i32 to index
    %c0_3 = arith.constant 0 : index
    %c0_4 = arith.constant 0 : index
    %6 = vector.load %arg3[%c0_2, %5, %c0_3, %c0_4] : memref<1x10x12x8xbf16, #tpu.memory_space<vmem>>, vector<1x1x10x8xbf16>
    %7 = vector.shape_cast %6 : vector<1x1x10x8xbf16> to vector<10x8xbf16>
    %c0_i32_5 = arith.constant 0 : i32
    %8 = arith.addi %0, %c0_i32_5 : i32
    %c0_i32_6 = arith.constant 0 : i32
    %9 = arith.addi %8, %c0_i32_6 : i32
    %c0_7 = arith.constant 0 : index
    %10 = arith.index_cast %9 : i32 to index
    %c1 = arith.constant 1 : index
    %c0_8 = arith.constant 0 : index
    %11 = vector.load %arg3[%c0_7, %10, %c1, %c0_8] : memref<1x10x12x8xbf16, #tpu.memory_space<vmem>>, vector<1x1x10x8xbf16>
    %12 = vector.shape_cast %11 : vector<1x1x10x8xbf16> to vector<10x8xbf16>
    %c0_i32_9 = arith.constant 0 : i32
    %13 = arith.addi %0, %c0_i32_9 : i32
    %c0_i32_10 = arith.constant 0 : i32
    %14 = arith.addi %13, %c0_i32_10 : i32
    %c0_11 = arith.constant 0 : index
    %15 = arith.index_cast %14 : i32 to index
    %c2 = arith.constant 2 : index
    %c0_12 = arith.constant 0 : index
    %16 = vector.load %arg3[%c0_11, %15, %c2, %c0_12] : memref<1x10x12x8xbf16, #tpu.memory_space<vmem>>, vector<1x1x10x8xbf16>
    %17 = vector.shape_cast %16 : vector<1x1x10x8xbf16> to vector<10x8xbf16>
    %18 = tpu.concatenate %7, %12, %17 in 1 : vector<10x8xbf16>, vector<10x8xbf16>, vector<10x8xbf16> -> vector<10x24xbf16>
    %c0_13 = arith.constant 0 : index
    %c0_14 = arith.constant 0 : index
    %c0_15 = arith.constant 0 : index
    %19 = vector.load %arg4[%c0_13, %c0_14, %c0_15] : memref<3x24x16xbf16, #tpu.memory_space<vmem>>, vector<1x24x16xbf16>
    %20 = vector.shape_cast %19 : vector<1x24x16xbf16> to vector<24x16xbf16>
    %cst_16 = arith.constant dense<0.000000e+00> : vector<10x16xf32>
    %21 = tpu.matmul %18, %20, %cst_16 {dimension_numbers = #tpu.dot_dimension_numbers<[1], [0], [0], [1], [0, 0, 1, 1], [], []>} : vector<10x24xbf16>, vector<24x16xbf16>, vector<10x16xf32> -> vector<10x16xf32>
    %22 = arith.addf %2, %21 : vector<10x16xf32>
    %c0_i32_17 = arith.constant 0 : i32
    %23 = arith.addi %0, %c0_i32_17 : i32
    %c1_i32 = arith.constant 1 : i32
    %24 = arith.addi %23, %c1_i32 : i32
    %c0_18 = arith.constant 0 : index
    %25 = arith.index_cast %24 : i32 to index
    %c0_19 = arith.constant 0 : index
    %c0_20 = arith.constant 0 : index
    %26 = vector.load %arg3[%c0_18, %25, %c0_19, %c0_20] : memref<1x10x12x8xbf16, #tpu.memory_space<vmem>>, vector<1x1x10x8xbf16>
    %27 = vector.shape_cast %26 : vector<1x1x10x8xbf16> to vector<10x8xbf16>
    %c0_i32_21 = arith.constant 0 : i32
    %28 = arith.addi %0, %c0_i32_21 : i32
    %c1_i32_22 = arith.constant 1 : i32
    %29 = arith.addi %28, %c1_i32_22 : i32
    %c0_23 = arith.constant 0 : index
    %30 = arith.index_cast %29 : i32 to index
    %c1_24 = arith.constant 1 : index
    %c0_25 = arith.constant 0 : index
    %31 = vector.load %arg3[%c0_23, %30, %c1_24, %c0_25] : memref<1x10x12x8xbf16, #tpu.memory_space<vmem>>, vector<1x1x10x8xbf16>
    %32 = vector.shape_cast %31 : vector<1x1x10x8xbf16> to vector<10x8xbf16>
    %c0_i32_26 = arith.constant 0 : i32
    %33 = arith.addi %0, %c0_i32_26 : i32
    %c1_i32_27 = arith.constant 1 : i32
    %34 = arith.addi %33, %c1_i32_27 : i32
    %c0_28 = arith.constant 0 : index
    %35 = arith.index_cast %34 : i32 to index
    %c2_29 = arith.constant 2 : index
    %c0_30 = arith.constant 0 : index
    %36 = vector.load %arg3[%c0_28, %35, %c2_29, %c0_30] : memref<1x10x12x8xbf16, #tpu.memory_space<vmem>>, vector<1x1x10x8xbf16>
    %37 = vector.shape_cast %36 : vector<1x1x10x8xbf16> to vector<10x8xbf16>
    %38 = tpu.concatenate %27, %32, %37 in 1 : vector<10x8xbf16>, vector<10x8xbf16>, vector<10x8xbf16> -> vector<10x24xbf16>
    %c1_31 = arith.constant 1 : index
    %c0_32 = arith.constant 0 : index
    %c0_33 = arith.constant 0 : index
    %39 = vector.load %arg4[%c1_31, %c0_32, %c0_33] : memref<3x24x16xbf16, #tpu.memory_space<vmem>>, vector<1x24x16xbf16>
    %40 = vector.shape_cast %39 : vector<1x24x16xbf16> to vector<24x16xbf16>
    %cst_34 = arith.constant dense<0.000000e+00> : vector<10x16xf32>
    %41 = tpu.matmul %38, %40, %cst_34 {dimension_numbers = #tpu.dot_dimension_numbers<[1], [0], [0], [1], [0, 0, 1, 1], [], []>} : vector<10x24xbf16>, vector<24x16xbf16>, vector<10x16xf32> -> vector<10x16xf32>
    %42 = arith.addf %22, %41 : vector<10x16xf32>
    %c0_i32_35 = arith.constant 0 : i32
    %43 = arith.addi %0, %c0_i32_35 : i32
    %c2_i32 = arith.constant 2 : i32
    %44 = arith.addi %43, %c2_i32 : i32
    %c0_36 = arith.constant 0 : index
    %45 = arith.index_cast %44 : i32 to index
    %c0_37 = arith.constant 0 : index
    %c0_38 = arith.constant 0 : index
    %46 = vector.load %arg3[%c0_36, %45, %c0_37, %c0_38] : memref<1x10x12x8xbf16, #tpu.memory_space<vmem>>, vector<1x1x10x8xbf16>
    %47 = vector.shape_cast %46 : vector<1x1x10x8xbf16> to vector<10x8xbf16>
    %c0_i32_39 = arith.constant 0 : i32
    %48 = arith.addi %0, %c0_i32_39 : i32
    %c2_i32_40 = arith.constant 2 : i32
    %49 = arith.addi %48, %c2_i32_40 : i32
    %c0_41 = arith.constant 0 : index
    %50 = arith.index_cast %49 : i32 to index
    %c1_42 = arith.constant 1 : index
    %c0_43 = arith.constant 0 : index
    %51 = vector.load %arg3[%c0_41, %50, %c1_42, %c0_43] : memref<1x10x12x8xbf16, #tpu.memory_space<vmem>>, vector<1x1x10x8xbf16>
    %52 = vector.shape_cast %51 : vector<1x1x10x8xbf16> to vector<10x8xbf16>
    %c0_i32_44 = arith.constant 0 : i32
    %53 = arith.addi %0, %c0_i32_44 : i32
    %c2_i32_45 = arith.constant 2 : i32
    %54 = arith.addi %53, %c2_i32_45 : i32
    %c0_46 = arith.constant 0 : index
    %55 = arith.index_cast %54 : i32 to index
    %c2_47 = arith.constant 2 : index
    %c0_48 = arith.constant 0 : index
    %56 = vector.load %arg3[%c0_46, %55, %c2_47, %c0_48] : memref<1x10x12x8xbf16, #tpu.memory_space<vmem>>, vector<1x1x10x8xbf16>
    %57 = vector.shape_cast %56 : vector<1x1x10x8xbf16> to vector<10x8xbf16>
    %58 = tpu.concatenate %47, %52, %57 in 1 : vector<10x8xbf16>, vector<10x8xbf16>, vector<10x8xbf16> -> vector<10x24xbf16>
    %c2_49 = arith.constant 2 : index
    %c0_50 = arith.constant 0 : index
    %c0_51 = arith.constant 0 : index
    %59 = vector.load %arg4[%c2_49, %c0_50, %c0_51] : memref<3x24x16xbf16, #tpu.memory_space<vmem>>, vector<1x24x16xbf16>
    %60 = vector.shape_cast %59 : vector<1x24x16xbf16> to vector<24x16xbf16>
    %cst_52 = arith.constant dense<0.000000e+00> : vector<10x16xf32>
    %61 = tpu.matmul %58, %60, %cst_52 {dimension_numbers = #tpu.dot_dimension_numbers<[1], [0], [0], [1], [0, 0, 1, 1], [], []>} : vector<10x24xbf16>, vector<24x16xbf16>, vector<10x16xf32> -> vector<10x16xf32>
    %62 = arith.addf %42, %61 : vector<10x16xf32>
    %63 = vector.broadcast %1 : vector<1x16xf32> to vector<10x16xf32>
    %64 = arith.addf %62, %63 : vector<10x16xf32>
    %cst_53 = arith.constant 0.000000e+00 : f32
    %65 = vector.broadcast %cst_53 : f32 to vector<10x16xf32>
    %66 = arith.maximumf %64, %65 : vector<10x16xf32>
    %c0_54 = arith.constant 0 : index
    %c0_55 = arith.constant 0 : index
    %c0_56 = arith.constant 0 : index
    %c0_57 = arith.constant 0 : index
    %67 = vector.load %arg6[%c0_54, %c0_55, %c0_56, %c0_57] : memref<1x8x10x16xf32, #tpu.memory_space<vmem>>, vector<1x1x10x16xf32>
    %68 = vector.shape_cast %67 : vector<1x1x10x16xf32> to vector<10x16xf32>
    %69 = vector.shape_cast %66 : vector<10x16xf32> to vector<1x1x10x16xf32>
    tpu.vector_store %arg6[%c0_54, %c0_55, %c0_56, %c0_57], %69 {strides = array<i32>} : memref<1x8x10x16xf32, #tpu.memory_space<vmem>>, vector<1x1x10x16xf32>,
    %cst_58 = arith.constant 0.000000e+00 : f32
    %70 = vector.broadcast %cst_58 : f32 to vector<10x16xf32>
    %c1_i32_59 = arith.constant 1 : i32
    %71 = arith.addi %0, %c1_i32_59 : i32
    %c0_i32_60 = arith.constant 0 : i32
    %72 = arith.addi %71, %c0_i32_60 : i32
    %c0_61 = arith.constant 0 : index
    %73 = arith.index_cast %72 : i32 to index
    %c0_62 = arith.constant 0 : index
    %c0_63 = arith.constant 0 : index
    %74 = vector.load %arg3[%c0_61, %73, %c0_62, %c0_63] : memref<1x10x12x8xbf16, #tpu.memory_space<vmem>>, vector<1x1x10x8xbf16>
    %75 = vector.shape_cast %74 : vector<1x1x10x8xbf16> to vector<10x8xbf16>
    %c1_i32_64 = arith.constant 1 : i32
    %76 = arith.addi %0, %c1_i32_64 : i32
    %c0_i32_65 = arith.constant 0 : i32
    %77 = arith.addi %76, %c0_i32_65 : i32
    %c0_66 = arith.constant 0 : index
    %78 = arith.index_cast %77 : i32 to index
    %c1_67 = arith.constant 1 : index
    %c0_68 = arith.constant 0 : index
    %79 = vector.load %arg3[%c0_66, %78, %c1_67, %c0_68] : memref<1x10x12x8xbf16, #tpu.memory_space<vmem>>, vector<1x1x10x8xbf16>
    %80 = vector.shape_cast %79 : vector<1x1x10x8xbf16> to vector<10x8xbf16>
    %c1_i32_69 = arith.constant 1 : i32
    %81 = arith.addi %0, %c1_i32_69 : i32
    %c0_i32_70 = arith.constant 0 : i32
    %82 = arith.addi %81, %c0_i32_70 : i32
    %c0_71 = arith.constant 0 : index
    %83 = arith.index_cast %82 : i32 to index
    %c2_72 = arith.constant 2 : index
    %c0_73 = arith.constant 0 : index
    %84 = vector.load %arg3[%c0_71, %83, %c2_72, %c0_73] : memref<1x10x12x8xbf16, #tpu.memory_space<vmem>>, vector<1x1x10x8xbf16>
    %85 = vector.shape_cast %84 : vector<1x1x10x8xbf16> to vector<10x8xbf16>
    %86 = tpu.concatenate %75, %80, %85 in 1 : vector<10x8xbf16>, vector<10x8xbf16>, vector<10x8xbf16> -> vector<10x24xbf16>
    %c0_74 = arith.constant 0 : index
    %c0_75 = arith.constant 0 : index
    %c0_76 = arith.constant 0 : index
    %87 = vector.load %arg4[%c0_74, %c0_75, %c0_76] : memref<3x24x16xbf16, #tpu.memory_space<vmem>>, vector<1x24x16xbf16>
    %88 = vector.shape_cast %87 : vector<1x24x16xbf16> to vector<24x16xbf16>
    %cst_77 = arith.constant dense<0.000000e+00> : vector<10x16xf32>
    %89 = tpu.matmul %86, %88, %cst_77 {dimension_numbers = #tpu.dot_dimension_numbers<[1], [0], [0], [1], [0, 0, 1, 1], [], []>} : vector<10x24xbf16>, vector<24x16xbf16>, vector<10x16xf32> -> vector<10x16xf32>
    %90 = arith.addf %70, %89 : vector<10x16xf32>
    %c1_i32_78 = arith.constant 1 : i32
    %91 = arith.addi %0, %c1_i32_78 : i32
    %c1_i32_79 = arith.constant 1 : i32
    %92 = arith.addi %91, %c1_i32_79 : i32
    %c0_80 = arith.constant 0 : index
    %93 = arith.index_cast %92 : i32 to index
    %c0_81 = arith.constant 0 : index
    %c0_82 = arith.constant 0 : index
    %94 = vector.load %arg3[%c0_80, %93, %c0_81, %c0_82] : memref<1x10x12x8xbf16, #tpu.memory_space<vmem>>, vector<1x1x10x8xbf16>
    %95 = vector.shape_cast %94 : vector<1x1x10x8xbf16> to vector<10x8xbf16>
    %c1_i32_83 = arith.constant 1 : i32
    %96 = arith.addi %0, %c1_i32_83 : i32
    %c1_i32_84 = arith.constant 1 : i32
    %97 = arith.addi %96, %c1_i32_84 : i32
    %c0_85 = arith.constant 0 : index
    %98 = arith.index_cast %97 : i32 to index
    %c1_86 = arith.constant 1 : index
    %c0_87 = arith.constant 0 : index
    %99 = vector.load %arg3[%c0_85, %98, %c1_86, %c0_87] : memref<1x10x12x8xbf16, #tpu.memory_space<vmem>>, vector<1x1x10x8xbf16>
    %100 = vector.shape_cast %99 : vector<1x1x10x8xbf16> to vector<10x8xbf16>
    %c1_i32_88 = arith.constant 1 : i32
    %101 = arith.addi %0, %c1_i32_88 : i32
    %c1_i32_89 = arith.constant 1 : i32
    %102 = arith.addi %101, %c1_i32_89 : i32
    %c0_90 = arith.constant 0 : index
    %103 = arith.index_cast %102 : i32 to index
    %c2_91 = arith.constant 2 : index
    %c0_92 = arith.constant 0 : index
    %104 = vector.load %arg3[%c0_90, %103, %c2_91, %c0_92] : memref<1x10x12x8xbf16, #tpu.memory_space<vmem>>, vector<1x1x10x8xbf16>
    %105 = vector.shape_cast %104 : vector<1x1x10x8xbf16> to vector<10x8xbf16>
    %106 = tpu.concatenate %95, %100, %105 in 1 : vector<10x8xbf16>, vector<10x8xbf16>, vector<10x8xbf16> -> vector<10x24xbf16>
    %c1_93 = arith.constant 1 : index
    %c0_94 = arith.constant 0 : index
    %c0_95 = arith.constant 0 : index
    %107 = vector.load %arg4[%c1_93, %c0_94, %c0_95] : memref<3x24x16xbf16, #tpu.memory_space<vmem>>, vector<1x24x16xbf16>
    %108 = vector.shape_cast %107 : vector<1x24x16xbf16> to vector<24x16xbf16>
    %cst_96 = arith.constant dense<0.000000e+00> : vector<10x16xf32>
    %109 = tpu.matmul %106, %108, %cst_96 {dimension_numbers = #tpu.dot_dimension_numbers<[1], [0], [0], [1], [0, 0, 1, 1], [], []>} : vector<10x24xbf16>, vector<24x16xbf16>, vector<10x16xf32> -> vector<10x16xf32>
    %110 = arith.addf %90, %109 : vector<10x16xf32>
    %c1_i32_97 = arith.constant 1 : i32
    %111 = arith.addi %0, %c1_i32_97 : i32
    %c2_i32_98 = arith.constant 2 : i32
    %112 = arith.addi %111, %c2_i32_98 : i32
    %c0_99 = arith.constant 0 : index
    %113 = arith.index_cast %112 : i32 to index
    %c0_100 = arith.constant 0 : index
    %c0_101 = arith.constant 0 : index
    %114 = vector.load %arg3[%c0_99, %113, %c0_100, %c0_101] : memref<1x10x12x8xbf16, #tpu.memory_space<vmem>>, vector<1x1x10x8xbf16>
    %115 = vector.shape_cast %114 : vector<1x1x10x8xbf16> to vector<10x8xbf16>
    %c1_i32_102 = arith.constant 1 : i32
    %116 = arith.addi %0, %c1_i32_102 : i32
    %c2_i32_103 = arith.constant 2 : i32
    %117 = arith.addi %116, %c2_i32_103 : i32
    %c0_104 = arith.constant 0 : index
    %118 = arith.index_cast %117 : i32 to index
    %c1_105 = arith.constant 1 : index
    %c0_106 = arith.constant 0 : index
    %119 = vector.load %arg3[%c0_104, %118, %c1_105, %c0_106] : memref<1x10x12x8xbf16, #tpu.memory_space<vmem>>, vector<1x1x10x8xbf16>
    %120 = vector.shape_cast %119 : vector<1x1x10x8xbf16> to vector<10x8xbf16>
    %c1_i32_107 = arith.constant 1 : i32
    %121 = arith.addi %0, %c1_i32_107 : i32
    %c2_i32_108 = arith.constant 2 : i32
    %122 = arith.addi %121, %c2_i32_108 : i32
    %c0_109 = arith.constant 0 : index
    %123 = arith.index_cast %122 : i32 to index
    %c2_110 = arith.constant 2 : index
    %c0_111 = arith.constant 0 : index
    %124 = vector.load %arg3[%c0_109, %123, %c2_110, %c0_111] : memref<1x10x12x8xbf16, #tpu.memory_space<vmem>>, vector<1x1x10x8xbf16>
    %125 = vector.shape_cast %124 : vector<1x1x10x8xbf16> to vector<10x8xbf16>
    %126 = tpu.concatenate %115, %120, %125 in 1 : vector<10x8xbf16>, vector<10x8xbf16>, vector<10x8xbf16> -> vector<10x24xbf16>
    %c2_112 = arith.constant 2 : index
    %c0_113 = arith.constant 0 : index
    %c0_114 = arith.constant 0 : index
    %127 = vector.load %arg4[%c2_112, %c0_113, %c0_114] : memref<3x24x16xbf16, #tpu.memory_space<vmem>>, vector<1x24x16xbf16>
    %128 = vector.shape_cast %127 : vector<1x24x16xbf16> to vector<24x16xbf16>
    %cst_115 = arith.constant dense<0.000000e+00> : vector<10x16xf32>
    %129 = tpu.matmul %126, %128, %cst_115 {dimension_numbers = #tpu.dot_dimension_numbers<[1], [0], [0], [1], [0, 0, 1, 1], [], []>} : vector<10x24xbf16>, vector<24x16xbf16>, vector<10x16xf32> -> vector<10x16xf32>
    %130 = arith.addf %110, %129 : vector<10x16xf32>
    %131 = vector.broadcast %1 : vector<1x16xf32> to vector<10x16xf32>
    %132 = arith.addf %130, %131 : vector<10x16xf32>
    %cst_116 = arith.constant 0.000000e+00 : f32
    %133 = vector.broadcast %cst_116 : f32 to vector<10x16xf32>
    %134 = arith.maximumf %132, %133 : vector<10x16xf32>
    %c0_117 = arith.constant 0 : index
    %c1_118 = arith.constant 1 : index
    %c0_119 = arith.constant 0 : index
    %c0_120 = arith.constant 0 : index
    %135 = vector.load %arg6[%c0_117, %c1_118, %c0_119, %c0_120] : memref<1x8x10x16xf32, #tpu.memory_space<vmem>>, vector<1x1x10x16xf32>
    %136 = vector.shape_cast %135 : vector<1x1x10x16xf32> to vector<10x16xf32>
    %137 = vector.shape_cast %134 : vector<10x16xf32> to vector<1x1x10x16xf32>
    tpu.vector_store %arg6[%c0_117, %c1_118, %c0_119, %c0_120], %137 {strides = array<i32>} : memref<1x8x10x16xf32, #tpu.memory_space<vmem>>, vector<1x1x10x16xf32>,
    %cst_121 = arith.constant 0.000000e+00 : f32
    %138 = vector.broadcast %cst_121 : f32 to vector<10x16xf32>
    %c2_i32_122 = arith.constant 2 : i32
    %139 = arith.addi %0, %c2_i32_122 : i32
    %c0_i32_123 = arith.constant 0 : i32
    %140 = arith.addi %139, %c0_i32_123 : i32
    %c0_124 = arith.constant 0 : index
    %141 = arith.index_cast %140 : i32 to index
    %c0_125 = arith.constant 0 : index
    %c0_126 = arith.constant 0 : index
    %142 = vector.load %arg3[%c0_124, %141, %c0_125, %c0_126] : memref<1x10x12x8xbf16, #tpu.memory_space<vmem>>, vector<1x1x10x8xbf16>
    %143 = vector.shape_cast %142 : vector<1x1x10x8xbf16> to vector<10x8xbf16>
    %c2_i32_127 = arith.constant 2 : i32
    %144 = arith.addi %0, %c2_i32_127 : i32
    %c0_i32_128 = arith.constant 0 : i32
    %145 = arith.addi %144, %c0_i32_128 : i32
    %c0_129 = arith.constant 0 : index
    %146 = arith.index_cast %145 : i32 to index
    %c1_130 = arith.constant 1 : index
    %c0_131 = arith.constant 0 : index
    %147 = vector.load %arg3[%c0_129, %146, %c1_130, %c0_131] : memref<1x10x12x8xbf16, #tpu.memory_space<vmem>>, vector<1x1x10x8xbf16>
    %148 = vector.shape_cast %147 : vector<1x1x10x8xbf16> to vector<10x8xbf16>
    %c2_i32_132 = arith.constant 2 : i32
    %149 = arith.addi %0, %c2_i32_132 : i32
    %c0_i32_133 = arith.constant 0 : i32
    %150 = arith.addi %149, %c0_i32_133 : i32
    %c0_134 = arith.constant 0 : index
    %151 = arith.index_cast %150 : i32 to index
    %c2_135 = arith.constant 2 : index
    %c0_136 = arith.constant 0 : index
    %152 = vector.load %arg3[%c0_134, %151, %c2_135, %c0_136] : memref<1x10x12x8xbf16, #tpu.memory_space<vmem>>, vector<1x1x10x8xbf16>
    %153 = vector.shape_cast %152 : vector<1x1x10x8xbf16> to vector<10x8xbf16>
    %154 = tpu.concatenate %143, %148, %153 in 1 : vector<10x8xbf16>, vector<10x8xbf16>, vector<10x8xbf16> -> vector<10x24xbf16>
    %c0_137 = arith.constant 0 : index
    %c0_138 = arith.constant 0 : index
    %c0_139 = arith.constant 0 : index
    %155 = vector.load %arg4[%c0_137, %c0_138, %c0_139] : memref<3x24x16xbf16, #tpu.memory_space<vmem>>, vector<1x24x16xbf16>
    %156 = vector.shape_cast %155 : vector<1x24x16xbf16> to vector<24x16xbf16>
    %cst_140 = arith.constant dense<0.000000e+00> : vector<10x16xf32>
    %157 = tpu.matmul %154, %156, %cst_140 {dimension_numbers = #tpu.dot_dimension_numbers<[1], [0], [0], [1], [0, 0, 1, 1], [], []>} : vector<10x24xbf16>, vector<24x16xbf16>, vector<10x16xf32> -> vector<10x16xf32>
    %158 = arith.addf %138, %157 : vector<10x16xf32>
    %c2_i32_141 = arith.constant 2 : i32
    %159 = arith.addi %0, %c2_i32_141 : i32
    %c1_i32_142 = arith.constant 1 : i32
    %160 = arith.addi %159, %c1_i32_142 : i32
    %c0_143 = arith.constant 0 : index
    %161 = arith.index_cast %160 : i32 to index
    %c0_144 = arith.constant 0 : index
    %c0_145 = arith.constant 0 : index
    %162 = vector.load %arg3[%c0_143, %161, %c0_144, %c0_145] : memref<1x10x12x8xbf16, #tpu.memory_space<vmem>>, vector<1x1x10x8xbf16>
    %163 = vector.shape_cast %162 : vector<1x1x10x8xbf16> to vector<10x8xbf16>
    %c2_i32_146 = arith.constant 2 : i32
    %164 = arith.addi %0, %c2_i32_146 : i32
    %c1_i32_147 = arith.constant 1 : i32
    %165 = arith.addi %164, %c1_i32_147 : i32
    %c0_148 = arith.constant 0 : index
    %166 = arith.index_cast %165 : i32 to index
    %c1_149 = arith.constant 1 : index
    %c0_150 = arith.constant 0 : index
    %167 = vector.load %arg3[%c0_148, %166, %c1_149, %c0_150] : memref<1x10x12x8xbf16, #tpu.memory_space<vmem>>, vector<1x1x10x8xbf16>
    %168 = vector.shape_cast %167 : vector<1x1x10x8xbf16> to vector<10x8xbf16>
    %c2_i32_151 = arith.constant 2 : i32
    %169 = arith.addi %0, %c2_i32_151 : i32
    %c1_i32_152 = arith.constant 1 : i32
    %170 = arith.addi %169, %c1_i32_152 : i32
    %c0_153 = arith.constant 0 : index
    %171 = arith.index_cast %170 : i32 to index
    %c2_154 = arith.constant 2 : index
    %c0_155 = arith.constant 0 : index
    %172 = vector.load %arg3[%c0_153, %171, %c2_154, %c0_155] : memref<1x10x12x8xbf16, #tpu.memory_space<vmem>>, vector<1x1x10x8xbf16>
    %173 = vector.shape_cast %172 : vector<1x1x10x8xbf16> to vector<10x8xbf16>
    %174 = tpu.concatenate %163, %168, %173 in 1 : vector<10x8xbf16>, vector<10x8xbf16>, vector<10x8xbf16> -> vector<10x24xbf16>
    %c1_156 = arith.constant 1 : index
    %c0_157 = arith.constant 0 : index
    %c0_158 = arith.constant 0 : index
    %175 = vector.load %arg4[%c1_156, %c0_157, %c0_158] : memref<3x24x16xbf16, #tpu.memory_space<vmem>>, vector<1x24x16xbf16>
    %176 = vector.shape_cast %175 : vector<1x24x16xbf16> to vector<24x16xbf16>
    %cst_159 = arith.constant dense<0.000000e+00> : vector<10x16xf32>
    %177 = tpu.matmul %174, %176, %cst_159 {dimension_numbers = #tpu.dot_dimension_numbers<[1], [0], [0], [1], [0, 0, 1, 1], [], []>} : vector<10x24xbf16>, vector<24x16xbf16>, vector<10x16xf32> -> vector<10x16xf32>
    %178 = arith.addf %158, %177 : vector<10x16xf32>
    %c2_i32_160 = arith.constant 2 : i32
    %179 = arith.addi %0, %c2_i32_160 : i32
    %c2_i32_161 = arith.constant 2 : i32
    %180 = arith.addi %179, %c2_i32_161 : i32
    %c0_162 = arith.constant 0 : index
    %181 = arith.index_cast %180 : i32 to index
    %c0_163 = arith.constant 0 : index
    %c0_164 = arith.constant 0 : index
    %182 = vector.load %arg3[%c0_162, %181, %c0_163, %c0_164] : memref<1x10x12x8xbf16, #tpu.memory_space<vmem>>, vector<1x1x10x8xbf16>
    %183 = vector.shape_cast %182 : vector<1x1x10x8xbf16> to vector<10x8xbf16>
    %c2_i32_165 = arith.constant 2 : i32
    %184 = arith.addi %0, %c2_i32_165 : i32
    %c2_i32_166 = arith.constant 2 : i32
    %185 = arith.addi %184, %c2_i32_166 : i32
    %c0_167 = arith.constant 0 : index
    %186 = arith.index_cast %185 : i32 to index
    %c1_168 = arith.constant 1 : index
    %c0_169 = arith.constant 0 : index
    %187 = vector.load %arg3[%c0_167, %186, %c1_168, %c0_169] : memref<1x10x12x8xbf16, #tpu.memory_space<vmem>>, vector<1x1x10x8xbf16>
    %188 = vector.shape_cast %187 : vector<1x1x10x8xbf16> to vector<10x8xbf16>
    %c2_i32_170 = arith.constant 2 : i32
    %189 = arith.addi %0, %c2_i32_170 : i32
    %c2_i32_171 = arith.constant 2 : i32
    %190 = arith.addi %189, %c2_i32_171 : i32
    %c0_172 = arith.constant 0 : index
    %191 = arith.index_cast %190 : i32 to index
    %c2_173 = arith.constant 2 : index
    %c0_174 = arith.constant 0 : index
    %192 = vector.load %arg3[%c0_172, %191, %c2_173, %c0_174] : memref<1x10x12x8xbf16, #tpu.memory_space<vmem>>, vector<1x1x10x8xbf16>
    %193 = vector.shape_cast %192 : vector<1x1x10x8xbf16> to vector<10x8xbf16>
    %194 = tpu.concatenate %183, %188, %193 in 1 : vector<10x8xbf16>, vector<10x8xbf16>, vector<10x8xbf16> -> vector<10x24xbf16>
    %c2_175 = arith.constant 2 : index
    %c0_176 = arith.constant 0 : index
    %c0_177 = arith.constant 0 : index
    %195 = vector.load %arg4[%c2_175, %c0_176, %c0_177] : memref<3x24x16xbf16, #tpu.memory_space<vmem>>, vector<1x24x16xbf16>
    %196 = vector.shape_cast %195 : vector<1x24x16xbf16> to vector<24x16xbf16>
    %cst_178 = arith.constant dense<0.000000e+00> : vector<10x16xf32>
    %197 = tpu.matmul %194, %196, %cst_178 {dimension_numbers = #tpu.dot_dimension_numbers<[1], [0], [0], [1], [0, 0, 1, 1], [], []>} : vector<10x24xbf16>, vector<24x16xbf16>, vector<10x16xf32> -> vector<10x16xf32>
    %198 = arith.addf %178, %197 : vector<10x16xf32>
    %199 = vector.broadcast %1 : vector<1x16xf32> to vector<10x16xf32>
    %200 = arith.addf %198, %199 : vector<10x16xf32>
    %cst_179 = arith.constant 0.000000e+00 : f32
    %201 = vector.broadcast %cst_179 : f32 to vector<10x16xf32>
    %202 = arith.maximumf %200, %201 : vector<10x16xf32>
    %c0_180 = arith.constant 0 : index
    %c2_181 = arith.constant 2 : index
    %c0_182 = arith.constant 0 : index
    %c0_183 = arith.constant 0 : index
    %203 = vector.load %arg6[%c0_180, %c2_181, %c0_182, %c0_183] : memref<1x8x10x16xf32, #tpu.memory_space<vmem>>, vector<1x1x10x16xf32>
    %204 = vector.shape_cast %203 : vector<1x1x10x16xf32> to vector<10x16xf32>
    %205 = vector.shape_cast %202 : vector<10x16xf32> to vector<1x1x10x16xf32>
    tpu.vector_store %arg6[%c0_180, %c2_181, %c0_182, %c0_183], %205 {strides = array<i32>} : memref<1x8x10x16xf32, #tpu.memory_space<vmem>>, vector<1x1x10x16xf32>,
    %cst_184 = arith.constant 0.000000e+00 : f32
    %206 = vector.broadcast %cst_184 : f32 to vector<10x16xf32>
    %c3_i32 = arith.constant 3 : i32
    %207 = arith.addi %0, %c3_i32 : i32
    %c0_i32_185 = arith.constant 0 : i32
    %208 = arith.addi %207, %c0_i32_185 : i32
    %c0_186 = arith.constant 0 : index
    %209 = arith.index_cast %208 : i32 to index
    %c0_187 = arith.constant 0 : index
    %c0_188 = arith.constant 0 : index
    %210 = vector.load %arg3[%c0_186, %209, %c0_187, %c0_188] : memref<1x10x12x8xbf16, #tpu.memory_space<vmem>>, vector<1x1x10x8xbf16>
    %211 = vector.shape_cast %210 : vector<1x1x10x8xbf16> to vector<10x8xbf16>
    %c3_i32_189 = arith.constant 3 : i32
    %212 = arith.addi %0, %c3_i32_189 : i32
    %c0_i32_190 = arith.constant 0 : i32
    %213 = arith.addi %212, %c0_i32_190 : i32
    %c0_191 = arith.constant 0 : index
    %214 = arith.index_cast %213 : i32 to index
    %c1_192 = arith.constant 1 : index
    %c0_193 = arith.constant 0 : index
    %215 = vector.load %arg3[%c0_191, %214, %c1_192, %c0_193] : memref<1x10x12x8xbf16, #tpu.memory_space<vmem>>, vector<1x1x10x8xbf16>
    %216 = vector.shape_cast %215 : vector<1x1x10x8xbf16> to vector<10x8xbf16>
    %c3_i32_194 = arith.constant 3 : i32
    %217 = arith.addi %0, %c3_i32_194 : i32
    %c0_i32_195 = arith.constant 0 : i32
    %218 = arith.addi %217, %c0_i32_195 : i32
    %c0_196 = arith.constant 0 : index
    %219 = arith.index_cast %218 : i32 to index
    %c2_197 = arith.constant 2 : index
    %c0_198 = arith.constant 0 : index
    %220 = vector.load %arg3[%c0_196, %219, %c2_197, %c0_198] : memref<1x10x12x8xbf16, #tpu.memory_space<vmem>>, vector<1x1x10x8xbf16>
    %221 = vector.shape_cast %220 : vector<1x1x10x8xbf16> to vector<10x8xbf16>
    %222 = tpu.concatenate %211, %216, %221 in 1 : vector<10x8xbf16>, vector<10x8xbf16>, vector<10x8xbf16> -> vector<10x24xbf16>
    %c0_199 = arith.constant 0 : index
    %c0_200 = arith.constant 0 : index
    %c0_201 = arith.constant 0 : index
    %223 = vector.load %arg4[%c0_199, %c0_200, %c0_201] : memref<3x24x16xbf16, #tpu.memory_space<vmem>>, vector<1x24x16xbf16>
    %224 = vector.shape_cast %223 : vector<1x24x16xbf16> to vector<24x16xbf16>
    %cst_202 = arith.constant dense<0.000000e+00> : vector<10x16xf32>
    %225 = tpu.matmul %222, %224, %cst_202 {dimension_numbers = #tpu.dot_dimension_numbers<[1], [0], [0], [1], [0, 0, 1, 1], [], []>} : vector<10x24xbf16>, vector<24x16xbf16>, vector<10x16xf32> -> vector<10x16xf32>
    %226 = arith.addf %206, %225 : vector<10x16xf32>
    %c3_i32_203 = arith.constant 3 : i32
    %227 = arith.addi %0, %c3_i32_203 : i32
    %c1_i32_204 = arith.constant 1 : i32
    %228 = arith.addi %227, %c1_i32_204 : i32
    %c0_205 = arith.constant 0 : index
    %229 = arith.index_cast %228 : i32 to index
    %c0_206 = arith.constant 0 : index
    %c0_207 = arith.constant 0 : index
    %230 = vector.load %arg3[%c0_205, %229, %c0_206, %c0_207] : memref<1x10x12x8xbf16, #tpu.memory_space<vmem>>, vector<1x1x10x8xbf16>
    %231 = vector.shape_cast %230 : vector<1x1x10x8xbf16> to vector<10x8xbf16>
    %c3_i32_208 = arith.constant 3 : i32
    %232 = arith.addi %0, %c3_i32_208 : i32
    %c1_i32_209 = arith.constant 1 : i32
    %233 = arith.addi %232, %c1_i32_209 : i32
    %c0_210 = arith.constant 0 : index
    %234 = arith.index_cast %233 : i32 to index
    %c1_211 = arith.constant 1 : index
    %c0_212 = arith.constant 0 : index
    %235 = vector.load %arg3[%c0_210, %234, %c1_211, %c0_212] : memref<1x10x12x8xbf16, #tpu.memory_space<vmem>>, vector<1x1x10x8xbf16>
    %236 = vector.shape_cast %235 : vector<1x1x10x8xbf16> to vector<10x8xbf16>
    %c3_i32_213 = arith.constant 3 : i32
    %237 = arith.addi %0, %c3_i32_213 : i32
    %c1_i32_214 = arith.constant 1 : i32
    %238 = arith.addi %237, %c1_i32_214 : i32
    %c0_215 = arith.constant 0 : index
    %239 = arith.index_cast %238 : i32 to index
    %c2_216 = arith.constant 2 : index
    %c0_217 = arith.constant 0 : index
    %240 = vector.load %arg3[%c0_215, %239, %c2_216, %c0_217] : memref<1x10x12x8xbf16, #tpu.memory_space<vmem>>, vector<1x1x10x8xbf16>
    %241 = vector.shape_cast %240 : vector<1x1x10x8xbf16> to vector<10x8xbf16>
    %242 = tpu.concatenate %231, %236, %241 in 1 : vector<10x8xbf16>, vector<10x8xbf16>, vector<10x8xbf16> -> vector<10x24xbf16>
    %c1_218 = arith.constant 1 : index
    %c0_219 = arith.constant 0 : index
    %c0_220 = arith.constant 0 : index
    %243 = vector.load %arg4[%c1_218, %c0_219, %c0_220] : memref<3x24x16xbf16, #tpu.memory_space<vmem>>, vector<1x24x16xbf16>
    %244 = vector.shape_cast %243 : vector<1x24x16xbf16> to vector<24x16xbf16>
    %cst_221 = arith.constant dense<0.000000e+00> : vector<10x16xf32>
    %245 = tpu.matmul %242, %244, %cst_221 {dimension_numbers = #tpu.dot_dimension_numbers<[1], [0], [0], [1], [0, 0, 1, 1], [], []>} : vector<10x24xbf16>, vector<24x16xbf16>, vector<10x16xf32> -> vector<10x16xf32>
    %246 = arith.addf %226, %245 : vector<10x16xf32>
    %c3_i32_222 = arith.constant 3 : i32
    %247 = arith.addi %0, %c3_i32_222 : i32
    %c2_i32_223 = arith.constant 2 : i32
    %248 = arith.addi %247, %c2_i32_223 : i32
    %c0_224 = arith.constant 0 : index
    %249 = arith.index_cast %248 : i32 to index
    %c0_225 = arith.constant 0 : index
    %c0_226 = arith.constant 0 : index
    %250 = vector.load %arg3[%c0_224, %249, %c0_225, %c0_226] : memref<1x10x12x8xbf16, #tpu.memory_space<vmem>>, vector<1x1x10x8xbf16>
    %251 = vector.shape_cast %250 : vector<1x1x10x8xbf16> to vector<10x8xbf16>
    %c3_i32_227 = arith.constant 3 : i32
    %252 = arith.addi %0, %c3_i32_227 : i32
    %c2_i32_228 = arith.constant 2 : i32
    %253 = arith.addi %252, %c2_i32_228 : i32
    %c0_229 = arith.constant 0 : index
    %254 = arith.index_cast %253 : i32 to index
    %c1_230 = arith.constant 1 : index
    %c0_231 = arith.constant 0 : index
    %255 = vector.load %arg3[%c0_229, %254, %c1_230, %c0_231] : memref<1x10x12x8xbf16, #tpu.memory_space<vmem>>, vector<1x1x10x8xbf16>
    %256 = vector.shape_cast %255 : vector<1x1x10x8xbf16> to vector<10x8xbf16>
    %c3_i32_232 = arith.constant 3 : i32
    %257 = arith.addi %0, %c3_i32_232 : i32
    %c2_i32_233 = arith.constant 2 : i32
    %258 = arith.addi %257, %c2_i32_233 : i32
    %c0_234 = arith.constant 0 : index
    %259 = arith.index_cast %258 : i32 to index
    %c2_235 = arith.constant 2 : index
    %c0_236 = arith.constant 0 : index
    %260 = vector.load %arg3[%c0_234, %259, %c2_235, %c0_236] : memref<1x10x12x8xbf16, #tpu.memory_space<vmem>>, vector<1x1x10x8xbf16>
    %261 = vector.shape_cast %260 : vector<1x1x10x8xbf16> to vector<10x8xbf16>
    %262 = tpu.concatenate %251, %256, %261 in 1 : vector<10x8xbf16>, vector<10x8xbf16>, vector<10x8xbf16> -> vector<10x24xbf16>
    %c2_237 = arith.constant 2 : index
    %c0_238 = arith.constant 0 : index
    %c0_239 = arith.constant 0 : index
    %263 = vector.load %arg4[%c2_237, %c0_238, %c0_239] : memref<3x24x16xbf16, #tpu.memory_space<vmem>>, vector<1x24x16xbf16>
    %264 = vector.shape_cast %263 : vector<1x24x16xbf16> to vector<24x16xbf16>
    %cst_240 = arith.constant dense<0.000000e+00> : vector<10x16xf32>
    %265 = tpu.matmul %262, %264, %cst_240 {dimension_numbers = #tpu.dot_dimension_numbers<[1], [0], [0], [1], [0, 0, 1, 1], [], []>} : vector<10x24xbf16>, vector<24x16xbf16>, vector<10x16xf32> -> vector<10x16xf32>
    %266 = arith.addf %246, %265 : vector<10x16xf32>
    %267 = vector.broadcast %1 : vector<1x16xf32> to vector<10x16xf32>
    %268 = arith.addf %266, %267 : vector<10x16xf32>
    %cst_241 = arith.constant 0.000000e+00 : f32
    %269 = vector.broadcast %cst_241 : f32 to vector<10x16xf32>
    %270 = arith.maximumf %268, %269 : vector<10x16xf32>
    %c0_242 = arith.constant 0 : index
    %c3 = arith.constant 3 : index
    %c0_243 = arith.constant 0 : index
    %c0_244 = arith.constant 0 : index
    %271 = vector.load %arg6[%c0_242, %c3, %c0_243, %c0_244] : memref<1x8x10x16xf32, #tpu.memory_space<vmem>>, vector<1x1x10x16xf32>
    %272 = vector.shape_cast %271 : vector<1x1x10x16xf32> to vector<10x16xf32>
    %273 = vector.shape_cast %270 : vector<10x16xf32> to vector<1x1x10x16xf32>
    tpu.vector_store %arg6[%c0_242, %c3, %c0_243, %c0_244], %273 {strides = array<i32>} : memref<1x8x10x16xf32, #tpu.memory_space<vmem>>, vector<1x1x10x16xf32>,
    %cst_245 = arith.constant 0.000000e+00 : f32
    %274 = vector.broadcast %cst_245 : f32 to vector<10x16xf32>
    %c4_i32 = arith.constant 4 : i32
    %275 = arith.addi %0, %c4_i32 : i32
    %c0_i32_246 = arith.constant 0 : i32
    %276 = arith.addi %275, %c0_i32_246 : i32
    %c0_247 = arith.constant 0 : index
    %277 = arith.index_cast %276 : i32 to index
    %c0_248 = arith.constant 0 : index
    %c0_249 = arith.constant 0 : index
    %278 = vector.load %arg3[%c0_247, %277, %c0_248, %c0_249] : memref<1x10x12x8xbf16, #tpu.memory_space<vmem>>, vector<1x1x10x8xbf16>
    %279 = vector.shape_cast %278 : vector<1x1x10x8xbf16> to vector<10x8xbf16>
    %c4_i32_250 = arith.constant 4 : i32
    %280 = arith.addi %0, %c4_i32_250 : i32
    %c0_i32_251 = arith.constant 0 : i32
    %281 = arith.addi %280, %c0_i32_251 : i32
    %c0_252 = arith.constant 0 : index
    %282 = arith.index_cast %281 : i32 to index
    %c1_253 = arith.constant 1 : index
    %c0_254 = arith.constant 0 : index
    %283 = vector.load %arg3[%c0_252, %282, %c1_253, %c0_254] : memref<1x10x12x8xbf16, #tpu.memory_space<vmem>>, vector<1x1x10x8xbf16>
    %284 = vector.shape_cast %283 : vector<1x1x10x8xbf16> to vector<10x8xbf16>
    %c4_i32_255 = arith.constant 4 : i32
    %285 = arith.addi %0, %c4_i32_255 : i32
    %c0_i32_256 = arith.constant 0 : i32
    %286 = arith.addi %285, %c0_i32_256 : i32
    %c0_257 = arith.constant 0 : index
    %287 = arith.index_cast %286 : i32 to index
    %c2_258 = arith.constant 2 : index
    %c0_259 = arith.constant 0 : index
    %288 = vector.load %arg3[%c0_257, %287, %c2_258, %c0_259] : memref<1x10x12x8xbf16, #tpu.memory_space<vmem>>, vector<1x1x10x8xbf16>
    %289 = vector.shape_cast %288 : vector<1x1x10x8xbf16> to vector<10x8xbf16>
    %290 = tpu.concatenate %279, %284, %289 in 1 : vector<10x8xbf16>, vector<10x8xbf16>, vector<10x8xbf16> -> vector<10x24xbf16>
    %c0_260 = arith.constant 0 : index
    %c0_261 = arith.constant 0 : index
    %c0_262 = arith.constant 0 : index
    %291 = vector.load %arg4[%c0_260, %c0_261, %c0_262] : memref<3x24x16xbf16, #tpu.memory_space<vmem>>, vector<1x24x16xbf16>
    %292 = vector.shape_cast %291 : vector<1x24x16xbf16> to vector<24x16xbf16>
    %cst_263 = arith.constant dense<0.000000e+00> : vector<10x16xf32>
    %293 = tpu.matmul %290, %292, %cst_263 {dimension_numbers = #tpu.dot_dimension_numbers<[1], [0], [0], [1], [0, 0, 1, 1], [], []>} : vector<10x24xbf16>, vector<24x16xbf16>, vector<10x16xf32> -> vector<10x16xf32>
    %294 = arith.addf %274, %293 : vector<10x16xf32>
    %c4_i32_264 = arith.constant 4 : i32
    %295 = arith.addi %0, %c4_i32_264 : i32
    %c1_i32_265 = arith.constant 1 : i32
    %296 = arith.addi %295, %c1_i32_265 : i32
    %c0_266 = arith.constant 0 : index
    %297 = arith.index_cast %296 : i32 to index
    %c0_267 = arith.constant 0 : index
    %c0_268 = arith.constant 0 : index
    %298 = vector.load %arg3[%c0_266, %297, %c0_267, %c0_268] : memref<1x10x12x8xbf16, #tpu.memory_space<vmem>>, vector<1x1x10x8xbf16>
    %299 = vector.shape_cast %298 : vector<1x1x10x8xbf16> to vector<10x8xbf16>
    %c4_i32_269 = arith.constant 4 : i32
    %300 = arith.addi %0, %c4_i32_269 : i32
    %c1_i32_270 = arith.constant 1 : i32
    %301 = arith.addi %300, %c1_i32_270 : i32
    %c0_271 = arith.constant 0 : index
    %302 = arith.index_cast %301 : i32 to index
    %c1_272 = arith.constant 1 : index
    %c0_273 = arith.constant 0 : index
    %303 = vector.load %arg3[%c0_271, %302, %c1_272, %c0_273] : memref<1x10x12x8xbf16, #tpu.memory_space<vmem>>, vector<1x1x10x8xbf16>
    %304 = vector.shape_cast %303 : vector<1x1x10x8xbf16> to vector<10x8xbf16>
    %c4_i32_274 = arith.constant 4 : i32
    %305 = arith.addi %0, %c4_i32_274 : i32
    %c1_i32_275 = arith.constant 1 : i32
    %306 = arith.addi %305, %c1_i32_275 : i32
    %c0_276 = arith.constant 0 : index
    %307 = arith.index_cast %306 : i32 to index
    %c2_277 = arith.constant 2 : index
    %c0_278 = arith.constant 0 : index
    %308 = vector.load %arg3[%c0_276, %307, %c2_277, %c0_278] : memref<1x10x12x8xbf16, #tpu.memory_space<vmem>>, vector<1x1x10x8xbf16>
    %309 = vector.shape_cast %308 : vector<1x1x10x8xbf16> to vector<10x8xbf16>
    %310 = tpu.concatenate %299, %304, %309 in 1 : vector<10x8xbf16>, vector<10x8xbf16>, vector<10x8xbf16> -> vector<10x24xbf16>
    %c1_279 = arith.constant 1 : index
    %c0_280 = arith.constant 0 : index
    %c0_281 = arith.constant 0 : index
    %311 = vector.load %arg4[%c1_279, %c0_280, %c0_281] : memref<3x24x16xbf16, #tpu.memory_space<vmem>>, vector<1x24x16xbf16>
    %312 = vector.shape_cast %311 : vector<1x24x16xbf16> to vector<24x16xbf16>
    %cst_282 = arith.constant dense<0.000000e+00> : vector<10x16xf32>
    %313 = tpu.matmul %310, %312, %cst_282 {dimension_numbers = #tpu.dot_dimension_numbers<[1], [0], [0], [1], [0, 0, 1, 1], [], []>} : vector<10x24xbf16>, vector<24x16xbf16>, vector<10x16xf32> -> vector<10x16xf32>
    %314 = arith.addf %294, %313 : vector<10x16xf32>
    %c4_i32_283 = arith.constant 4 : i32
    %315 = arith.addi %0, %c4_i32_283 : i32
    %c2_i32_284 = arith.constant 2 : i32
    %316 = arith.addi %315, %c2_i32_284 : i32
    %c0_285 = arith.constant 0 : index
    %317 = arith.index_cast %316 : i32 to index
    %c0_286 = arith.constant 0 : index
    %c0_287 = arith.constant 0 : index
    %318 = vector.load %arg3[%c0_285, %317, %c0_286, %c0_287] : memref<1x10x12x8xbf16, #tpu.memory_space<vmem>>, vector<1x1x10x8xbf16>
    %319 = vector.shape_cast %318 : vector<1x1x10x8xbf16> to vector<10x8xbf16>
    %c4_i32_288 = arith.constant 4 : i32
    %320 = arith.addi %0, %c4_i32_288 : i32
    %c2_i32_289 = arith.constant 2 : i32
    %321 = arith.addi %320, %c2_i32_289 : i32
    %c0_290 = arith.constant 0 : index
    %322 = arith.index_cast %321 : i32 to index
    %c1_291 = arith.constant 1 : index
    %c0_292 = arith.constant 0 : index
    %323 = vector.load %arg3[%c0_290, %322, %c1_291, %c0_292] : memref<1x10x12x8xbf16, #tpu.memory_space<vmem>>, vector<1x1x10x8xbf16>
    %324 = vector.shape_cast %323 : vector<1x1x10x8xbf16> to vector<10x8xbf16>
    %c4_i32_293 = arith.constant 4 : i32
    %325 = arith.addi %0, %c4_i32_293 : i32
    %c2_i32_294 = arith.constant 2 : i32
    %326 = arith.addi %325, %c2_i32_294 : i32
    %c0_295 = arith.constant 0 : index
    %327 = arith.index_cast %326 : i32 to index
    %c2_296 = arith.constant 2 : index
    %c0_297 = arith.constant 0 : index
    %328 = vector.load %arg3[%c0_295, %327, %c2_296, %c0_297] : memref<1x10x12x8xbf16, #tpu.memory_space<vmem>>, vector<1x1x10x8xbf16>
    %329 = vector.shape_cast %328 : vector<1x1x10x8xbf16> to vector<10x8xbf16>
    %330 = tpu.concatenate %319, %324, %329 in 1 : vector<10x8xbf16>, vector<10x8xbf16>, vector<10x8xbf16> -> vector<10x24xbf16>
    %c2_298 = arith.constant 2 : index
    %c0_299 = arith.constant 0 : index
    %c0_300 = arith.constant 0 : index
    %331 = vector.load %arg4[%c2_298, %c0_299, %c0_300] : memref<3x24x16xbf16, #tpu.memory_space<vmem>>, vector<1x24x16xbf16>
    %332 = vector.shape_cast %331 : vector<1x24x16xbf16> to vector<24x16xbf16>
    %cst_301 = arith.constant dense<0.000000e+00> : vector<10x16xf32>
    %333 = tpu.matmul %330, %332, %cst_301 {dimension_numbers = #tpu.dot_dimension_numbers<[1], [0], [0], [1], [0, 0, 1, 1], [], []>} : vector<10x24xbf16>, vector<24x16xbf16>, vector<10x16xf32> -> vector<10x16xf32>
    %334 = arith.addf %314, %333 : vector<10x16xf32>
    %335 = vector.broadcast %1 : vector<1x16xf32> to vector<10x16xf32>
    %336 = arith.addf %334, %335 : vector<10x16xf32>
    %cst_302 = arith.constant 0.000000e+00 : f32
    %337 = vector.broadcast %cst_302 : f32 to vector<10x16xf32>
    %338 = arith.maximumf %336, %337 : vector<10x16xf32>
    %c0_303 = arith.constant 0 : index
    %c4 = arith.constant 4 : index
    %c0_304 = arith.constant 0 : index
    %c0_305 = arith.constant 0 : index
    %339 = vector.load %arg6[%c0_303, %c4, %c0_304, %c0_305] : memref<1x8x10x16xf32, #tpu.memory_space<vmem>>, vector<1x1x10x16xf32>
    %340 = vector.shape_cast %339 : vector<1x1x10x16xf32> to vector<10x16xf32>
    %341 = vector.shape_cast %338 : vector<10x16xf32> to vector<1x1x10x16xf32>
    tpu.vector_store %arg6[%c0_303, %c4, %c0_304, %c0_305], %341 {strides = array<i32>} : memref<1x8x10x16xf32, #tpu.memory_space<vmem>>, vector<1x1x10x16xf32>,
    %cst_306 = arith.constant 0.000000e+00 : f32
    %342 = vector.broadcast %cst_306 : f32 to vector<10x16xf32>
    %c5_i32 = arith.constant 5 : i32
    %343 = arith.addi %0, %c5_i32 : i32
    %c0_i32_307 = arith.constant 0 : i32
    %344 = arith.addi %343, %c0_i32_307 : i32
    %c0_308 = arith.constant 0 : index
    %345 = arith.index_cast %344 : i32 to index
    %c0_309 = arith.constant 0 : index
    %c0_310 = arith.constant 0 : index
    %346 = vector.load %arg3[%c0_308, %345, %c0_309, %c0_310] : memref<1x10x12x8xbf16, #tpu.memory_space<vmem>>, vector<1x1x10x8xbf16>
    %347 = vector.shape_cast %346 : vector<1x1x10x8xbf16> to vector<10x8xbf16>
    %c5_i32_311 = arith.constant 5 : i32
    %348 = arith.addi %0, %c5_i32_311 : i32
    %c0_i32_312 = arith.constant 0 : i32
    %349 = arith.addi %348, %c0_i32_312 : i32
    %c0_313 = arith.constant 0 : index
    %350 = arith.index_cast %349 : i32 to index
    %c1_314 = arith.constant 1 : index
    %c0_315 = arith.constant 0 : index
    %351 = vector.load %arg3[%c0_313, %350, %c1_314, %c0_315] : memref<1x10x12x8xbf16, #tpu.memory_space<vmem>>, vector<1x1x10x8xbf16>
    %352 = vector.shape_cast %351 : vector<1x1x10x8xbf16> to vector<10x8xbf16>
    %c5_i32_316 = arith.constant 5 : i32
    %353 = arith.addi %0, %c5_i32_316 : i32
    %c0_i32_317 = arith.constant 0 : i32
    %354 = arith.addi %353, %c0_i32_317 : i32
    %c0_318 = arith.constant 0 : index
    %355 = arith.index_cast %354 : i32 to index
    %c2_319 = arith.constant 2 : index
    %c0_320 = arith.constant 0 : index
    %356 = vector.load %arg3[%c0_318, %355, %c2_319, %c0_320] : memref<1x10x12x8xbf16, #tpu.memory_space<vmem>>, vector<1x1x10x8xbf16>
    %357 = vector.shape_cast %356 : vector<1x1x10x8xbf16> to vector<10x8xbf16>
    %358 = tpu.concatenate %347, %352, %357 in 1 : vector<10x8xbf16>, vector<10x8xbf16>, vector<10x8xbf16> -> vector<10x24xbf16>
    %c0_321 = arith.constant 0 : index
    %c0_322 = arith.constant 0 : index
    %c0_323 = arith.constant 0 : index
    %359 = vector.load %arg4[%c0_321, %c0_322, %c0_323] : memref<3x24x16xbf16, #tpu.memory_space<vmem>>, vector<1x24x16xbf16>
    %360 = vector.shape_cast %359 : vector<1x24x16xbf16> to vector<24x16xbf16>
    %cst_324 = arith.constant dense<0.000000e+00> : vector<10x16xf32>
    %361 = tpu.matmul %358, %360, %cst_324 {dimension_numbers = #tpu.dot_dimension_numbers<[1], [0], [0], [1], [0, 0, 1, 1], [], []>} : vector<10x24xbf16>, vector<24x16xbf16>, vector<10x16xf32> -> vector<10x16xf32>
    %362 = arith.addf %342, %361 : vector<10x16xf32>
    %c5_i32_325 = arith.constant 5 : i32
    %363 = arith.addi %0, %c5_i32_325 : i32
    %c1_i32_326 = arith.constant 1 : i32
    %364 = arith.addi %363, %c1_i32_326 : i32
    %c0_327 = arith.constant 0 : index
    %365 = arith.index_cast %364 : i32 to index
    %c0_328 = arith.constant 0 : index
    %c0_329 = arith.constant 0 : index
    %366 = vector.load %arg3[%c0_327, %365, %c0_328, %c0_329] : memref<1x10x12x8xbf16, #tpu.memory_space<vmem>>, vector<1x1x10x8xbf16>
    %367 = vector.shape_cast %366 : vector<1x1x10x8xbf16> to vector<10x8xbf16>
    %c5_i32_330 = arith.constant 5 : i32
    %368 = arith.addi %0, %c5_i32_330 : i32
    %c1_i32_331 = arith.constant 1 : i32
    %369 = arith.addi %368, %c1_i32_331 : i32
    %c0_332 = arith.constant 0 : index
    %370 = arith.index_cast %369 : i32 to index
    %c1_333 = arith.constant 1 : index
    %c0_334 = arith.constant 0 : index
    %371 = vector.load %arg3[%c0_332, %370, %c1_333, %c0_334] : memref<1x10x12x8xbf16, #tpu.memory_space<vmem>>, vector<1x1x10x8xbf16>
    %372 = vector.shape_cast %371 : vector<1x1x10x8xbf16> to vector<10x8xbf16>
    %c5_i32_335 = arith.constant 5 : i32
    %373 = arith.addi %0, %c5_i32_335 : i32
    %c1_i32_336 = arith.constant 1 : i32
    %374 = arith.addi %373, %c1_i32_336 : i32
    %c0_337 = arith.constant 0 : index
    %375 = arith.index_cast %374 : i32 to index
    %c2_338 = arith.constant 2 : index
    %c0_339 = arith.constant 0 : index
    %376 = vector.load %arg3[%c0_337, %375, %c2_338, %c0_339] : memref<1x10x12x8xbf16, #tpu.memory_space<vmem>>, vector<1x1x10x8xbf16>
    %377 = vector.shape_cast %376 : vector<1x1x10x8xbf16> to vector<10x8xbf16>
    %378 = tpu.concatenate %367, %372, %377 in 1 : vector<10x8xbf16>, vector<10x8xbf16>, vector<10x8xbf16> -> vector<10x24xbf16>
    %c1_340 = arith.constant 1 : index
    %c0_341 = arith.constant 0 : index
    %c0_342 = arith.constant 0 : index
    %379 = vector.load %arg4[%c1_340, %c0_341, %c0_342] : memref<3x24x16xbf16, #tpu.memory_space<vmem>>, vector<1x24x16xbf16>
    %380 = vector.shape_cast %379 : vector<1x24x16xbf16> to vector<24x16xbf16>
    %cst_343 = arith.constant dense<0.000000e+00> : vector<10x16xf32>
    %381 = tpu.matmul %378, %380, %cst_343 {dimension_numbers = #tpu.dot_dimension_numbers<[1], [0], [0], [1], [0, 0, 1, 1], [], []>} : vector<10x24xbf16>, vector<24x16xbf16>, vector<10x16xf32> -> vector<10x16xf32>
    %382 = arith.addf %362, %381 : vector<10x16xf32>
    %c5_i32_344 = arith.constant 5 : i32
    %383 = arith.addi %0, %c5_i32_344 : i32
    %c2_i32_345 = arith.constant 2 : i32
    %384 = arith.addi %383, %c2_i32_345 : i32
    %c0_346 = arith.constant 0 : index
    %385 = arith.index_cast %384 : i32 to index
    %c0_347 = arith.constant 0 : index
    %c0_348 = arith.constant 0 : index
    %386 = vector.load %arg3[%c0_346, %385, %c0_347, %c0_348] : memref<1x10x12x8xbf16, #tpu.memory_space<vmem>>, vector<1x1x10x8xbf16>
    %387 = vector.shape_cast %386 : vector<1x1x10x8xbf16> to vector<10x8xbf16>
    %c5_i32_349 = arith.constant 5 : i32
    %388 = arith.addi %0, %c5_i32_349 : i32
    %c2_i32_350 = arith.constant 2 : i32
    %389 = arith.addi %388, %c2_i32_350 : i32
    %c0_351 = arith.constant 0 : index
    %390 = arith.index_cast %389 : i32 to index
    %c1_352 = arith.constant 1 : index
    %c0_353 = arith.constant 0 : index
    %391 = vector.load %arg3[%c0_351, %390, %c1_352, %c0_353] : memref<1x10x12x8xbf16, #tpu.memory_space<vmem>>, vector<1x1x10x8xbf16>
    %392 = vector.shape_cast %391 : vector<1x1x10x8xbf16> to vector<10x8xbf16>
    %c5_i32_354 = arith.constant 5 : i32
    %393 = arith.addi %0, %c5_i32_354 : i32
    %c2_i32_355 = arith.constant 2 : i32
    %394 = arith.addi %393, %c2_i32_355 : i32
    %c0_356 = arith.constant 0 : index
    %395 = arith.index_cast %394 : i32 to index
    %c2_357 = arith.constant 2 : index
    %c0_358 = arith.constant 0 : index
    %396 = vector.load %arg3[%c0_356, %395, %c2_357, %c0_358] : memref<1x10x12x8xbf16, #tpu.memory_space<vmem>>, vector<1x1x10x8xbf16>
    %397 = vector.shape_cast %396 : vector<1x1x10x8xbf16> to vector<10x8xbf16>
    %398 = tpu.concatenate %387, %392, %397 in 1 : vector<10x8xbf16>, vector<10x8xbf16>, vector<10x8xbf16> -> vector<10x24xbf16>
    %c2_359 = arith.constant 2 : index
    %c0_360 = arith.constant 0 : index
    %c0_361 = arith.constant 0 : index
    %399 = vector.load %arg4[%c2_359, %c0_360, %c0_361] : memref<3x24x16xbf16, #tpu.memory_space<vmem>>, vector<1x24x16xbf16>
    %400 = vector.shape_cast %399 : vector<1x24x16xbf16> to vector<24x16xbf16>
    %cst_362 = arith.constant dense<0.000000e+00> : vector<10x16xf32>
    %401 = tpu.matmul %398, %400, %cst_362 {dimension_numbers = #tpu.dot_dimension_numbers<[1], [0], [0], [1], [0, 0, 1, 1], [], []>} : vector<10x24xbf16>, vector<24x16xbf16>, vector<10x16xf32> -> vector<10x16xf32>
    %402 = arith.addf %382, %401 : vector<10x16xf32>
    %403 = vector.broadcast %1 : vector<1x16xf32> to vector<10x16xf32>
    %404 = arith.addf %402, %403 : vector<10x16xf32>
    %cst_363 = arith.constant 0.000000e+00 : f32
    %405 = vector.broadcast %cst_363 : f32 to vector<10x16xf32>
    %406 = arith.maximumf %404, %405 : vector<10x16xf32>
    %c0_364 = arith.constant 0 : index
    %c5 = arith.constant 5 : index
    %c0_365 = arith.constant 0 : index
    %c0_366 = arith.constant 0 : index
    %407 = vector.load %arg6[%c0_364, %c5, %c0_365, %c0_366] : memref<1x8x10x16xf32, #tpu.memory_space<vmem>>, vector<1x1x10x16xf32>
    %408 = vector.shape_cast %407 : vector<1x1x10x16xf32> to vector<10x16xf32>
    %409 = vector.shape_cast %406 : vector<10x16xf32> to vector<1x1x10x16xf32>
    tpu.vector_store %arg6[%c0_364, %c5, %c0_365, %c0_366], %409 {strides = array<i32>} : memref<1x8x10x16xf32, #tpu.memory_space<vmem>>, vector<1x1x10x16xf32>,
    %cst_367 = arith.constant 0.000000e+00 : f32
    %410 = vector.broadcast %cst_367 : f32 to vector<10x16xf32>
    %c6_i32 = arith.constant 6 : i32
    %411 = arith.addi %0, %c6_i32 : i32
    %c0_i32_368 = arith.constant 0 : i32
    %412 = arith.addi %411, %c0_i32_368 : i32
    %c0_369 = arith.constant 0 : index
    %413 = arith.index_cast %412 : i32 to index
    %c0_370 = arith.constant 0 : index
    %c0_371 = arith.constant 0 : index
    %414 = vector.load %arg3[%c0_369, %413, %c0_370, %c0_371] : memref<1x10x12x8xbf16, #tpu.memory_space<vmem>>, vector<1x1x10x8xbf16>
    %415 = vector.shape_cast %414 : vector<1x1x10x8xbf16> to vector<10x8xbf16>
    %c6_i32_372 = arith.constant 6 : i32
    %416 = arith.addi %0, %c6_i32_372 : i32
    %c0_i32_373 = arith.constant 0 : i32
    %417 = arith.addi %416, %c0_i32_373 : i32
    %c0_374 = arith.constant 0 : index
    %418 = arith.index_cast %417 : i32 to index
    %c1_375 = arith.constant 1 : index
    %c0_376 = arith.constant 0 : index
    %419 = vector.load %arg3[%c0_374, %418, %c1_375, %c0_376] : memref<1x10x12x8xbf16, #tpu.memory_space<vmem>>, vector<1x1x10x8xbf16>
    %420 = vector.shape_cast %419 : vector<1x1x10x8xbf16> to vector<10x8xbf16>
    %c6_i32_377 = arith.constant 6 : i32
    %421 = arith.addi %0, %c6_i32_377 : i32
    %c0_i32_378 = arith.constant 0 : i32
    %422 = arith.addi %421, %c0_i32_378 : i32
    %c0_379 = arith.constant 0 : index
    %423 = arith.index_cast %422 : i32 to index
    %c2_380 = arith.constant 2 : index
    %c0_381 = arith.constant 0 : index
    %424 = vector.load %arg3[%c0_379, %423, %c2_380, %c0_381] : memref<1x10x12x8xbf16, #tpu.memory_space<vmem>>, vector<1x1x10x8xbf16>
    %425 = vector.shape_cast %424 : vector<1x1x10x8xbf16> to vector<10x8xbf16>
    %426 = tpu.concatenate %415, %420, %425 in 1 : vector<10x8xbf16>, vector<10x8xbf16>, vector<10x8xbf16> -> vector<10x24xbf16>
    %c0_382 = arith.constant 0 : index
    %c0_383 = arith.constant 0 : index
    %c0_384 = arith.constant 0 : index
    %427 = vector.load %arg4[%c0_382, %c0_383, %c0_384] : memref<3x24x16xbf16, #tpu.memory_space<vmem>>, vector<1x24x16xbf16>
    %428 = vector.shape_cast %427 : vector<1x24x16xbf16> to vector<24x16xbf16>
    %cst_385 = arith.constant dense<0.000000e+00> : vector<10x16xf32>
    %429 = tpu.matmul %426, %428, %cst_385 {dimension_numbers = #tpu.dot_dimension_numbers<[1], [0], [0], [1], [0, 0, 1, 1], [], []>} : vector<10x24xbf16>, vector<24x16xbf16>, vector<10x16xf32> -> vector<10x16xf32>
    %430 = arith.addf %410, %429 : vector<10x16xf32>
    %c6_i32_386 = arith.constant 6 : i32
    %431 = arith.addi %0, %c6_i32_386 : i32
    %c1_i32_387 = arith.constant 1 : i32
    %432 = arith.addi %431, %c1_i32_387 : i32
    %c0_388 = arith.constant 0 : index
    %433 = arith.index_cast %432 : i32 to index
    %c0_389 = arith.constant 0 : index
    %c0_390 = arith.constant 0 : index
    %434 = vector.load %arg3[%c0_388, %433, %c0_389, %c0_390] : memref<1x10x12x8xbf16, #tpu.memory_space<vmem>>, vector<1x1x10x8xbf16>
    %435 = vector.shape_cast %434 : vector<1x1x10x8xbf16> to vector<10x8xbf16>
    %c6_i32_391 = arith.constant 6 : i32
    %436 = arith.addi %0, %c6_i32_391 : i32
    %c1_i32_392 = arith.constant 1 : i32
    %437 = arith.addi %436, %c1_i32_392 : i32
    %c0_393 = arith.constant 0 : index
    %438 = arith.index_cast %437 : i32 to index
    %c1_394 = arith.constant 1 : index
    %c0_395 = arith.constant 0 : index
    %439 = vector.load %arg3[%c0_393, %438, %c1_394, %c0_395] : memref<1x10x12x8xbf16, #tpu.memory_space<vmem>>, vector<1x1x10x8xbf16>
    %440 = vector.shape_cast %439 : vector<1x1x10x8xbf16> to vector<10x8xbf16>
    %c6_i32_396 = arith.constant 6 : i32
    %441 = arith.addi %0, %c6_i32_396 : i32
    %c1_i32_397 = arith.constant 1 : i32
    %442 = arith.addi %441, %c1_i32_397 : i32
    %c0_398 = arith.constant 0 : index
    %443 = arith.index_cast %442 : i32 to index
    %c2_399 = arith.constant 2 : index
    %c0_400 = arith.constant 0 : index
    %444 = vector.load %arg3[%c0_398, %443, %c2_399, %c0_400] : memref<1x10x12x8xbf16, #tpu.memory_space<vmem>>, vector<1x1x10x8xbf16>
    %445 = vector.shape_cast %444 : vector<1x1x10x8xbf16> to vector<10x8xbf16>
    %446 = tpu.concatenate %435, %440, %445 in 1 : vector<10x8xbf16>, vector<10x8xbf16>, vector<10x8xbf16> -> vector<10x24xbf16>
    %c1_401 = arith.constant 1 : index
    %c0_402 = arith.constant 0 : index
    %c0_403 = arith.constant 0 : index
    %447 = vector.load %arg4[%c1_401, %c0_402, %c0_403] : memref<3x24x16xbf16, #tpu.memory_space<vmem>>, vector<1x24x16xbf16>
    %448 = vector.shape_cast %447 : vector<1x24x16xbf16> to vector<24x16xbf16>
    %cst_404 = arith.constant dense<0.000000e+00> : vector<10x16xf32>
    %449 = tpu.matmul %446, %448, %cst_404 {dimension_numbers = #tpu.dot_dimension_numbers<[1], [0], [0], [1], [0, 0, 1, 1], [], []>} : vector<10x24xbf16>, vector<24x16xbf16>, vector<10x16xf32> -> vector<10x16xf32>
    %450 = arith.addf %430, %449 : vector<10x16xf32>
    %c6_i32_405 = arith.constant 6 : i32
    %451 = arith.addi %0, %c6_i32_405 : i32
    %c2_i32_406 = arith.constant 2 : i32
    %452 = arith.addi %451, %c2_i32_406 : i32
    %c0_407 = arith.constant 0 : index
    %453 = arith.index_cast %452 : i32 to index
    %c0_408 = arith.constant 0 : index
    %c0_409 = arith.constant 0 : index
    %454 = vector.load %arg3[%c0_407, %453, %c0_408, %c0_409] : memref<1x10x12x8xbf16, #tpu.memory_space<vmem>>, vector<1x1x10x8xbf16>
    %455 = vector.shape_cast %454 : vector<1x1x10x8xbf16> to vector<10x8xbf16>
    %c6_i32_410 = arith.constant 6 : i32
    %456 = arith.addi %0, %c6_i32_410 : i32
    %c2_i32_411 = arith.constant 2 : i32
    %457 = arith.addi %456, %c2_i32_411 : i32
    %c0_412 = arith.constant 0 : index
    %458 = arith.index_cast %457 : i32 to index
    %c1_413 = arith.constant 1 : index
    %c0_414 = arith.constant 0 : index
    %459 = vector.load %arg3[%c0_412, %458, %c1_413, %c0_414] : memref<1x10x12x8xbf16, #tpu.memory_space<vmem>>, vector<1x1x10x8xbf16>
    %460 = vector.shape_cast %459 : vector<1x1x10x8xbf16> to vector<10x8xbf16>
    %c6_i32_415 = arith.constant 6 : i32
    %461 = arith.addi %0, %c6_i32_415 : i32
    %c2_i32_416 = arith.constant 2 : i32
    %462 = arith.addi %461, %c2_i32_416 : i32
    %c0_417 = arith.constant 0 : index
    %463 = arith.index_cast %462 : i32 to index
    %c2_418 = arith.constant 2 : index
    %c0_419 = arith.constant 0 : index
    %464 = vector.load %arg3[%c0_417, %463, %c2_418, %c0_419] : memref<1x10x12x8xbf16, #tpu.memory_space<vmem>>, vector<1x1x10x8xbf16>
    %465 = vector.shape_cast %464 : vector<1x1x10x8xbf16> to vector<10x8xbf16>
    %466 = tpu.concatenate %455, %460, %465 in 1 : vector<10x8xbf16>, vector<10x8xbf16>, vector<10x8xbf16> -> vector<10x24xbf16>
    %c2_420 = arith.constant 2 : index
    %c0_421 = arith.constant 0 : index
    %c0_422 = arith.constant 0 : index
    %467 = vector.load %arg4[%c2_420, %c0_421, %c0_422] : memref<3x24x16xbf16, #tpu.memory_space<vmem>>, vector<1x24x16xbf16>
    %468 = vector.shape_cast %467 : vector<1x24x16xbf16> to vector<24x16xbf16>
    %cst_423 = arith.constant dense<0.000000e+00> : vector<10x16xf32>
    %469 = tpu.matmul %466, %468, %cst_423 {dimension_numbers = #tpu.dot_dimension_numbers<[1], [0], [0], [1], [0, 0, 1, 1], [], []>} : vector<10x24xbf16>, vector<24x16xbf16>, vector<10x16xf32> -> vector<10x16xf32>
    %470 = arith.addf %450, %469 : vector<10x16xf32>
    %471 = vector.broadcast %1 : vector<1x16xf32> to vector<10x16xf32>
    %472 = arith.addf %470, %471 : vector<10x16xf32>
    %cst_424 = arith.constant 0.000000e+00 : f32
    %473 = vector.broadcast %cst_424 : f32 to vector<10x16xf32>
    %474 = arith.maximumf %472, %473 : vector<10x16xf32>
    %c0_425 = arith.constant 0 : index
    %c6 = arith.constant 6 : index
    %c0_426 = arith.constant 0 : index
    %c0_427 = arith.constant 0 : index
    %475 = vector.load %arg6[%c0_425, %c6, %c0_426, %c0_427] : memref<1x8x10x16xf32, #tpu.memory_space<vmem>>, vector<1x1x10x16xf32>
    %476 = vector.shape_cast %475 : vector<1x1x10x16xf32> to vector<10x16xf32>
    %477 = vector.shape_cast %474 : vector<10x16xf32> to vector<1x1x10x16xf32>
    tpu.vector_store %arg6[%c0_425, %c6, %c0_426, %c0_427], %477 {strides = array<i32>} : memref<1x8x10x16xf32, #tpu.memory_space<vmem>>, vector<1x1x10x16xf32>,
    %cst_428 = arith.constant 0.000000e+00 : f32
    %478 = vector.broadcast %cst_428 : f32 to vector<10x16xf32>
    %c7_i32 = arith.constant 7 : i32
    %479 = arith.addi %0, %c7_i32 : i32
    %c0_i32_429 = arith.constant 0 : i32
    %480 = arith.addi %479, %c0_i32_429 : i32
    %c0_430 = arith.constant 0 : index
    %481 = arith.index_cast %480 : i32 to index
    %c0_431 = arith.constant 0 : index
    %c0_432 = arith.constant 0 : index
    %482 = vector.load %arg3[%c0_430, %481, %c0_431, %c0_432] : memref<1x10x12x8xbf16, #tpu.memory_space<vmem>>, vector<1x1x10x8xbf16>
    %483 = vector.shape_cast %482 : vector<1x1x10x8xbf16> to vector<10x8xbf16>
    %c7_i32_433 = arith.constant 7 : i32
    %484 = arith.addi %0, %c7_i32_433 : i32
    %c0_i32_434 = arith.constant 0 : i32
    %485 = arith.addi %484, %c0_i32_434 : i32
    %c0_435 = arith.constant 0 : index
    %486 = arith.index_cast %485 : i32 to index
    %c1_436 = arith.constant 1 : index
    %c0_437 = arith.constant 0 : index
    %487 = vector.load %arg3[%c0_435, %486, %c1_436, %c0_437] : memref<1x10x12x8xbf16, #tpu.memory_space<vmem>>, vector<1x1x10x8xbf16>
    %488 = vector.shape_cast %487 : vector<1x1x10x8xbf16> to vector<10x8xbf16>
    %c7_i32_438 = arith.constant 7 : i32
    %489 = arith.addi %0, %c7_i32_438 : i32
    %c0_i32_439 = arith.constant 0 : i32
    %490 = arith.addi %489, %c0_i32_439 : i32
    %c0_440 = arith.constant 0 : index
    %491 = arith.index_cast %490 : i32 to index
    %c2_441 = arith.constant 2 : index
    %c0_442 = arith.constant 0 : index
    %492 = vector.load %arg3[%c0_440, %491, %c2_441, %c0_442] : memref<1x10x12x8xbf16, #tpu.memory_space<vmem>>, vector<1x1x10x8xbf16>
    %493 = vector.shape_cast %492 : vector<1x1x10x8xbf16> to vector<10x8xbf16>
    %494 = tpu.concatenate %483, %488, %493 in 1 : vector<10x8xbf16>, vector<10x8xbf16>, vector<10x8xbf16> -> vector<10x24xbf16>
    %c0_443 = arith.constant 0 : index
    %c0_444 = arith.constant 0 : index
    %c0_445 = arith.constant 0 : index
    %495 = vector.load %arg4[%c0_443, %c0_444, %c0_445] : memref<3x24x16xbf16, #tpu.memory_space<vmem>>, vector<1x24x16xbf16>
    %496 = vector.shape_cast %495 : vector<1x24x16xbf16> to vector<24x16xbf16>
    %cst_446 = arith.constant dense<0.000000e+00> : vector<10x16xf32>
    %497 = tpu.matmul %494, %496, %cst_446 {dimension_numbers = #tpu.dot_dimension_numbers<[1], [0], [0], [1], [0, 0, 1, 1], [], []>} : vector<10x24xbf16>, vector<24x16xbf16>, vector<10x16xf32> -> vector<10x16xf32>
    %498 = arith.addf %478, %497 : vector<10x16xf32>
    %c7_i32_447 = arith.constant 7 : i32
    %499 = arith.addi %0, %c7_i32_447 : i32
    %c1_i32_448 = arith.constant 1 : i32
    %500 = arith.addi %499, %c1_i32_448 : i32
    %c0_449 = arith.constant 0 : index
    %501 = arith.index_cast %500 : i32 to index
    %c0_450 = arith.constant 0 : index
    %c0_451 = arith.constant 0 : index
    %502 = vector.load %arg3[%c0_449, %501, %c0_450, %c0_451] : memref<1x10x12x8xbf16, #tpu.memory_space<vmem>>, vector<1x1x10x8xbf16>
    %503 = vector.shape_cast %502 : vector<1x1x10x8xbf16> to vector<10x8xbf16>
    %c7_i32_452 = arith.constant 7 : i32
    %504 = arith.addi %0, %c7_i32_452 : i32
    %c1_i32_453 = arith.constant 1 : i32
    %505 = arith.addi %504, %c1_i32_453 : i32
    %c0_454 = arith.constant 0 : index
    %506 = arith.index_cast %505 : i32 to index
    %c1_455 = arith.constant 1 : index
    %c0_456 = arith.constant 0 : index
    %507 = vector.load %arg3[%c0_454, %506, %c1_455, %c0_456] : memref<1x10x12x8xbf16, #tpu.memory_space<vmem>>, vector<1x1x10x8xbf16>
    %508 = vector.shape_cast %507 : vector<1x1x10x8xbf16> to vector<10x8xbf16>
    %c7_i32_457 = arith.constant 7 : i32
    %509 = arith.addi %0, %c7_i32_457 : i32
    %c1_i32_458 = arith.constant 1 : i32
    %510 = arith.addi %509, %c1_i32_458 : i32
    %c0_459 = arith.constant 0 : index
    %511 = arith.index_cast %510 : i32 to index
    %c2_460 = arith.constant 2 : index
    %c0_461 = arith.constant 0 : index
    %512 = vector.load %arg3[%c0_459, %511, %c2_460, %c0_461] : memref<1x10x12x8xbf16, #tpu.memory_space<vmem>>, vector<1x1x10x8xbf16>
    %513 = vector.shape_cast %512 : vector<1x1x10x8xbf16> to vector<10x8xbf16>
    %514 = tpu.concatenate %503, %508, %513 in 1 : vector<10x8xbf16>, vector<10x8xbf16>, vector<10x8xbf16> -> vector<10x24xbf16>
    %c1_462 = arith.constant 1 : index
    %c0_463 = arith.constant 0 : index
    %c0_464 = arith.constant 0 : index
    %515 = vector.load %arg4[%c1_462, %c0_463, %c0_464] : memref<3x24x16xbf16, #tpu.memory_space<vmem>>, vector<1x24x16xbf16>
    %516 = vector.shape_cast %515 : vector<1x24x16xbf16> to vector<24x16xbf16>
    %cst_465 = arith.constant dense<0.000000e+00> : vector<10x16xf32>
    %517 = tpu.matmul %514, %516, %cst_465 {dimension_numbers = #tpu.dot_dimension_numbers<[1], [0], [0], [1], [0, 0, 1, 1], [], []>} : vector<10x24xbf16>, vector<24x16xbf16>, vector<10x16xf32> -> vector<10x16xf32>
    %518 = arith.addf %498, %517 : vector<10x16xf32>
    %c7_i32_466 = arith.constant 7 : i32
    %519 = arith.addi %0, %c7_i32_466 : i32
    %c2_i32_467 = arith.constant 2 : i32
    %520 = arith.addi %519, %c2_i32_467 : i32
    %c0_468 = arith.constant 0 : index
    %521 = arith.index_cast %520 : i32 to index
    %c0_469 = arith.constant 0 : index
    %c0_470 = arith.constant 0 : index
    %522 = vector.load %arg3[%c0_468, %521, %c0_469, %c0_470] : memref<1x10x12x8xbf16, #tpu.memory_space<vmem>>, vector<1x1x10x8xbf16>
    %523 = vector.shape_cast %522 : vector<1x1x10x8xbf16> to vector<10x8xbf16>
    %c7_i32_471 = arith.constant 7 : i32
    %524 = arith.addi %0, %c7_i32_471 : i32
    %c2_i32_472 = arith.constant 2 : i32
    %525 = arith.addi %524, %c2_i32_472 : i32
    %c0_473 = arith.constant 0 : index
    %526 = arith.index_cast %525 : i32 to index
    %c1_474 = arith.constant 1 : index
    %c0_475 = arith.constant 0 : index
    %527 = vector.load %arg3[%c0_473, %526, %c1_474, %c0_475] : memref<1x10x12x8xbf16, #tpu.memory_space<vmem>>, vector<1x1x10x8xbf16>
    %528 = vector.shape_cast %527 : vector<1x1x10x8xbf16> to vector<10x8xbf16>
    %c7_i32_476 = arith.constant 7 : i32
    %529 = arith.addi %0, %c7_i32_476 : i32
    %c2_i32_477 = arith.constant 2 : i32
    %530 = arith.addi %529, %c2_i32_477 : i32
    %c0_478 = arith.constant 0 : index
    %531 = arith.index_cast %530 : i32 to index
    %c2_479 = arith.constant 2 : index
    %c0_480 = arith.constant 0 : index
    %532 = vector.load %arg3[%c0_478, %531, %c2_479, %c0_480] : memref<1x10x12x8xbf16, #tpu.memory_space<vmem>>, vector<1x1x10x8xbf16>
    %533 = vector.shape_cast %532 : vector<1x1x10x8xbf16> to vector<10x8xbf16>
    %534 = tpu.concatenate %523, %528, %533 in 1 : vector<10x8xbf16>, vector<10x8xbf16>, vector<10x8xbf16> -> vector<10x24xbf16>
    %c2_481 = arith.constant 2 : index
    %c0_482 = arith.constant 0 : index
    %c0_483 = arith.constant 0 : index
    %535 = vector.load %arg4[%c2_481, %c0_482, %c0_483] : memref<3x24x16xbf16, #tpu.memory_space<vmem>>, vector<1x24x16xbf16>
    %536 = vector.shape_cast %535 : vector<1x24x16xbf16> to vector<24x16xbf16>
    %cst_484 = arith.constant dense<0.000000e+00> : vector<10x16xf32>
    %537 = tpu.matmul %534, %536, %cst_484 {dimension_numbers = #tpu.dot_dimension_numbers<[1], [0], [0], [1], [0, 0, 1, 1], [], []>} : vector<10x24xbf16>, vector<24x16xbf16>, vector<10x16xf32> -> vector<10x16xf32>
    %538 = arith.addf %518, %537 : vector<10x16xf32>
    %539 = vector.broadcast %1 : vector<1x16xf32> to vector<10x16xf32>
    %540 = arith.addf %538, %539 : vector<10x16xf32>
    %cst_485 = arith.constant 0.000000e+00 : f32
    %541 = vector.broadcast %cst_485 : f32 to vector<10x16xf32>
    %542 = arith.maximumf %540, %541 : vector<10x16xf32>
    %c0_486 = arith.constant 0 : index
    %c7 = arith.constant 7 : index
    %c0_487 = arith.constant 0 : index
    %c0_488 = arith.constant 0 : index
    %543 = vector.load %arg6[%c0_486, %c7, %c0_487, %c0_488] : memref<1x8x10x16xf32, #tpu.memory_space<vmem>>, vector<1x1x10x16xf32>
    %544 = vector.shape_cast %543 : vector<1x1x10x16xf32> to vector<10x16xf32>
    %545 = vector.shape_cast %542 : vector<10x16xf32> to vector<1x1x10x16xf32>
    tpu.vector_store %arg6[%c0_486, %c7, %c0_487, %c0_488], %545 {strides = array<i32>} : memref<1x8x10x16xf32, #tpu.memory_space<vmem>>, vector<1x1x10x16xf32>,
    return
  }
  func.func @transform_0(%arg0: i32, %arg1: i32, %arg2: i32) -> (i32, i32, i32, i32) {
    %c0_i32 = arith.constant 0 : i32
    %c0_i32_0 = arith.constant 0 : i32
    %c0_i32_1 = arith.constant 0 : i32
    %c0_i32_2 = arith.constant 0 : i32
    return %arg0, %c0_i32, %c0_i32_0, %c0_i32_1 : i32, i32, i32, i32
  }
  func.func @transform_1(%arg0: i32, %arg1: i32, %arg2: i32) -> (i32, i32, i32) {
    %c0_i32 = arith.constant 0 : i32
    %c0_i32_0 = arith.constant 0 : i32
    %c0_i32_1 = arith.constant 0 : i32
    return %c0_i32, %c0_i32_0, %arg1 : i32, i32, i32
  }
  func.func @transform_2(%arg0: i32, %arg1: i32, %arg2: i32) -> (i32, i32) {
    %c0_i32 = arith.constant 0 : i32
    %c0_i32_0 = arith.constant 0 : i32
    return %c0_i32, %arg1 : i32, i32
  }
  func.func @transform_3(%arg0: i32, %arg1: i32, %arg2: i32) -> (i32, i32, i32, i32) {
    %c0_i32 = arith.constant 0 : i32
    %c0_i32_0 = arith.constant 0 : i32
    return %arg0, %arg2, %c0_i32, %arg1 : i32, i32, i32, i32
  }
}

</mosaic_0001>

<bundles_post_ra>
// kernel: tpu_custom_call.1
= control target key start
LH: loop header
LB: loop body
LE: loop exit
PB: predicated region body
PF: predicated region fallthrough
CT: control target
= control target key end

     0   :  { %s3466_s12 = smov 0   ;;  %s3468_s13 = smov 0   ;;  %s4136_s0 = inlined_call_operand.vmem [shape: bf16[2,10,12,8], index: 0, kind: input, shape index: {}]   ;;  %s4137_s1 = inlined_call_operand.vmem [shape: bf16[3,24,16], index: 1, kind: input, shape index: {}]   ;;  %s4138_s2 = inlined_call_operand.vmem [shape: f32[1,16], index: 2, kind: input, shape index: {}]   ;;  %s4139_s3 = inlined_call_operand.vmem [shape: f32[2,8,10,16], index: 3, kind: output, shape index: {}]  }
   0x1   :  { %s3470_s14 = smov 0  }
   0x2 LB: > { %s32_s15 = sadd.s32 1, %s3436_s13  ;;  %p2699_p0 = scmp.ge.s32.totalorder %s3440_s14, 1  ;;  %s3440_s14 = sphi %s3470_s14, %s13_s14   ;;  %s3436_s13 = sphi %s3468_s13, %s4141_s13   ;;  %s3432_s12 = sphi %s3466_s12, %s4140_s12  }
   0x3   : > { %p34_p1 = scmp.ge.s32.totalorder %s32_s15, 2  ;;  %p177_p2 = scmp.lt.s32.totalorder %s3440_s14, 3 }
   0x5   : > { %s4143_s15 = smov (%p34_p1, %s32_s15), 0  ;;  %p178_p3 = pnand %p2699_p0, %p177_p2 }
   0x6   : > { %p216_p4 = scmp.lt.s32.totalorder (!%p178_p3), %s3432_s12, 1  ;;  %s3444_s28 = smov (!%p178_p3), 8  }
   0x7   : > { %181 = sbr.rel (%p178_p3) target bundleno = 439 (0x1b7), region = 32  ;;  %s3445_s29 = smov (!%p178_p3), 16  }
   0xc   : > { %vm337_vm0 = vcmask 1043456   ;;  %v3442_v0 = vmov 0.0   ;;  %v3346_v1 = vld [vmem:[%s4137_s1 + $0x14] ss:$0 sps:$4 sm:$0xff]   ;;  %s4145_s12 = smov (!%p216_p4, %s3432_s12), 1  ;;  %v3350_v5 = vld [vmem:[%s4137_s1 + $0xc] sm:$0xff]  }
   0xd   : > { %3077 = vmatprep.subr.bf16.mxu0 %v3442_v0  ;;  %3085 = vmatprep.subr.bf16.mxu1 %v3442_v0  ;;  %v3347_v2 = vld [vmem:[%s4137_s1 + $0x8] ss:$0 sps:$4 sm:$0xff]   ;;  %v339_v3 = vsel %vm337_vm0, %v3346_v1, 0  ;;  %s3269_s20 = smul.u32 80, %s4145_s12  ;;  %v3351_v6 = vld [vmem:[%s4137_s1] sm:$0xff]   ;;  %vm3443_vm1 = vmmov 0  }
   0xe   : > { %3078 = vmatpush3.bf16.msra.mxu0 %v339_v3  ;;  %v394_v4 = vsel %vm337_vm0, %v3347_v2, 0  ;;  %3081 = vmatprep.mubr.msk.bf16.mxu0 %vm3443_vm1, %v3442_v0  ;;  %vm275_vm2 = vcmask 64512   ;;  %vm279_vm3 = vcmask 130048   ;;  %vm334_vm4 = vcmask 195584   ;;  %s3004_s4 = sshll.u32 %s4145_s12, 7 }
   0xf   : > { %3086 = vmatpush3.bf16.msra.mxu1 %v394_v4  ;;  %3079 = vmatprep.subr.bf16.mxu0 %v3442_v0  ;;  %s3507_s27 = scalar_lea.vmem %s4136_s0, %s3269_s20  ;;  %s4078_s7 = scalar_lea.vmem %s4139_s3, %s3004_s4  ;;  %vm545_vm5 = vcmask 123904  }
  0x10   : > { %3087 = vmatprep.subr.bf16.mxu1 %v3442_v0  ;;  %v3511_v7 = vld [vmem:[%s3507_s27 + $0x8] sm:$0xf]  ;;  %v2708_v8 = vld [vmem:[%s3507_s27 + $0xc] sm:$0x3]  ;;  %v3515_v9 = vld [vmem:[%s3507_s27] sm:$0xf]  ;;  %3089 = vmatprep.mubr.msk.bf16.mxu1 %vm3443_vm1, %v3442_v0 }
  0x11   : > { %v2711_v10 = vcombine.low %v3511_v7, %v2708_v8  ;;  %v250_v11 = vld [vmem:[%s3507_s27 + $0x4] sm:$0x3]  ;;  %v2709_v12 = vld [vmem:[%s3507_s27 + $0x8] sm:$0xe]  ;;  %v251_v14 = vld [vmem:[%s3507_s27] sm:$0xe] }
  0x12   : > { %3080 = vmatpush3.bf16.msra.mxu0 %v3350_v5  ;;  %v2704_v13 = vcombine.low %v3515_v9, %v250_v11  ;;  %v3523_v15 = vld [vmem:[%s3507_s27 + $0x10] sm:$0xf]  ;;  %v2724_v16 = vld [vmem:[%s3507_s27 + $0x14] sm:$0x3]  ;;  %v2712_v24 = vcombine.low %v2709_v12, %v2708_v8  ;;  %v2705_v28 = vcombine.low %v251_v14, %v250_v11  ;;  %v3535_v30 = vld [vmem:[%s3507_s27 + $0x8] sm:$0xf] }
  0x13   : > { %3088 = vmatpush3.bf16.msra.mxu1 %v3351_v6  ;;  %3093 = vmatprep.subr.bf16.mxu0 %v3442_v0  ;;  %v302_v17 = vshrl.u32 %v2711_v10, 16  ;;  %v304_v18 = vshll.u32 %v2711_v10, 16  ;;  %v2727_v19 = vcombine.low %v3523_v15, %v2724_v16  ;;  %v3529_v20 = vld [vmem:[%s3507_s27 + $0x10] sm:$0xf]  ;;  %v2745_v21 = vld [vmem:[%s3507_s27 + $0x14] sm:$0x3] }
  0x14   : > { %3101 = vmatprep.subr.bf16.mxu1 %v3442_v0  ;;  %v261_v22 = vshrl.u32 %v2704_v13, 16  ;;  %v263_v23 = vshll.u32 %v2704_v13, 16  ;;  %v2748_v29 = vcombine.low %v3529_v20, %v2745_v21  ;;  %v2738_v31 = vld [vmem:[%s3507_s27 + $0xc] sm:$0x3]  ;;  %v2725_v33 = vld [vmem:[%s3507_s27 + $0x10] sm:$0xe] }
  0x15   : > { %v306_v25 = vrot.slane %v304_v18, 1  ;;  %v456_v26 = vshll.u32 %v2727_v19, 16  ;;  %v313_v35 = vrot.slane %v2712_v24, 1  ;;  %v454_v36 = vshrl.u32 %v2727_v19, 16  ;;  %v3547_v42 = vld [vmem:[%s3507_s27 + $0x18] sm:$0xf] }
  0x16   : > { %v265_v27 = vrot.slane %v263_v23, 1  ;;  %v597_v38 = vshll.u32 %v2748_v29, 16  ;;  %v2741_v39 = vcombine.low %v3535_v30, %v2738_v31  ;;  %v272_v40 = vrot.slane %v2705_v28, 1  ;;  %v2761_v43 = vld [vmem:[%s3507_s27 + $0x1c] sm:$0x3] }
  0x17   : > { %v307_v32 = vor.u32 %v306_v25, %v302_v17  ;;  %v458_v37 = vrot.slane %v456_v26, 1  ;;  %v2728_v41 = vcombine.low %v2725_v33, %v2724_v16  ;;  %v2746_v44 = vld [vmem:[%s3507_s27 + $0x10] sm:$0xe]  ;;  %v595_v45 = vshrl.u32 %v2748_v29, 16  ;;  %v3555_v52 = vld [vmem:[%s3507_s27 + $0x18] sm:$0xf] }
  0x18   : > { %v266_v34 = vor.u32 %v265_v27, %v261_v22  ;;  %v599_v47 = vrot.slane %v597_v38, 1  ;;  %v562_v48 = vshll.u32 %v2741_v39, 16  ;;  %v2764_v49 = vcombine.low %v3547_v42, %v2761_v43  ;;  %v2783_v53 = vld [vmem:[%s3507_s27 + $0x1c] sm:$0x3]  ;;  %v2739_v54 = vld [vmem:[%s3507_s27 + $0x8] sm:$0xe] }
  0x19   : > { %308 = vrot.lane.b32.xlu0 %v307_v32, %s3444_s28  ;;  %v459_v46 = vor.u32 %v458_v37, %v454_v36  ;;  %v465_v50 = vrot.slane %v2728_v41, 1  ;;  %v2749_v51 = vcombine.low %v2746_v44, %v2745_v21  ;;  %v560_v55 = vshrl.u32 %v2741_v39, 16  ;;  %v3563_v62 = vld [vmem:[%s3507_s27 + $0x10] sm:$0xf]  ;;  %v2776_v63 = vld [vmem:[%s3507_s27 + $0x14] sm:$0x3] }
  0x1a   : > { %267 = vrot.lane.b32.xlu1 %v266_v34, %s3444_s28  ;;  %v600_v56 = vor.u32 %v599_v47, %v595_v45  ;;  %v564_v57 = vrot.slane %v562_v48, 1  ;;  %v746_v58 = vshll.u32 %v2764_v49, 16  ;;  %v2786_v59 = vcombine.low %v3555_v52, %v2783_v53  ;;  %v2762_v1 = vld [vmem:[%s3507_s27 + $0x18] sm:$0xe]  ;;  %v3571_v11 = vld [vmem:[%s3507_s27 + $0x20] sm:$0xf] }
  0x1b   : > { %v606_v60 = vrot.slane %v2749_v51, 1  ;;  %v2742_v61 = vcombine.low %v2739_v54, %v2738_v31  ;;  %v744_v2 = vshrl.u32 %v2764_v49, 16  ;;  %v2779_v6 = vcombine.low %v3563_v62, %v2776_v63  ;;  %v2799_v12 = vld [vmem:[%s3507_s27 + $0x24] sm:$0x3]  ;;  %v2784_v13 = vld [vmem:[%s3507_s27 + $0x18] sm:$0xe] }
  0x1c   : > { %v565_v3 = vor.u32 %v564_v57, %v560_v55  ;;  %v748_v4 = vrot.slane %v746_v58, 1  ;;  %v880_v5 = vshll.u32 %v2786_v59, 16  ;;  %v2765_v10 = vcombine.low %v2762_v1, %v2761_v43  ;;  %v3579_v23 = vld [vmem:[%s3507_s27 + $0x20] sm:$0xf]  ;;  %v2821_v24 = vld [vmem:[%s3507_s27 + $0x24] sm:$0x3] }
  0x1d   : > { %314 = vrot.lane.b32.xlu0 %v313_v35, %s3445_s29  ;;  %v571_v8 = vrot.slane %v2742_v61, 1  ;;  %v878_v14 = vshrl.u32 %v2786_v59, 16  ;;  %v845_v18 = vshll.u32 %v2779_v6, 16  ;;  %v2802_v19 = vcombine.low %v3571_v11, %v2799_v12  ;;  %v2777_v25 = vld [vmem:[%s3507_s27 + $0x10] sm:$0xe] }
  0x1e   : > { %273 = vrot.lane.b32.xlu1 %v272_v40, %s3445_s29  ;;  %v749_v16 = vor.u32 %v748_v4, %v744_v2  ;;  %v882_v17 = vrot.slane %v880_v5, 1  ;;  %v755_v21 = vrot.slane %v2765_v10, 1  ;;  %v2787_v22 = vcombine.low %v2784_v13, %v2783_v53  ;;  %v3587_v34 = vld [vmem:[%s3507_s27 + $0x18] sm:$0xf]  ;;  %v2814_v35 = vld [vmem:[%s3507_s27 + $0x1c] sm:$0x3] }
  0x1f   : > { %v843_v26 = vshrl.u32 %v2779_v6, 16  ;;  %v847_v28 = vrot.slane %v845_v18, 1  ;;  %v1029_v29 = vshll.u32 %v2802_v19, 16  ;;  %v2824_v31 = vcombine.low %v3579_v23, %v2821_v24  ;;  %v2800_v36 = vld [vmem:[%s3507_s27 + $0x20] sm:$0xe] }
  0x20   : > { %v883_v27 = vor.u32 %v882_v17, %v878_v14  ;;  %v889_v32 = vrot.slane %v2787_v22, 1  ;;  %v2780_v33 = vcombine.low %v2777_v25, %v2776_v63  ;;  %v1027_v37 = vshrl.u32 %v2802_v19, 16  ;;  %v3595_v45 = vld [vmem:[%s3507_s27 + $0x28] sm:$0xf]  ;;  %v2822_v47 = vld [vmem:[%s3507_s27 + $0x20] sm:$0xe] }
  0x21   : > { %460 = vrot.lane.b32.xlu0 %v459_v46, %s3444_s28  ;;  %v848_v38 = vor.u32 %v847_v28, %v843_v26  ;;  %v1031_v39 = vrot.slane %v1029_v29, 1  ;;  %v1163_v40 = vshll.u32 %v2824_v31, 16  ;;  %v2817_v41 = vcombine.low %v3587_v34, %v2814_v35  ;;  %v2837_v46 = vld [vmem:[%s3507_s27 + $0x2c] sm:$0x3]  ;;  %v2815_v58 = vld [vmem:[%s3507_s27 + $0x18] sm:$0xe] }
  0x22   : > { %466 = vrot.lane.b32.xlu1 %v465_v50, %s3445_s29  ;;  %v854_v43 = vrot.slane %v2780_v33, 1  ;;  %v2803_v44 = vcombine.low %v2800_v36, %v2799_v12  ;;  %v1161_v48 = vshrl.u32 %v2824_v31, 16  ;;  %v2840_v53 = vcombine.low %v3595_v45, %v2837_v46  ;;  %v2859_v57 = vld [vmem:[%s3507_s27 + $0x2c] sm:$0x3]  ;;  %v3611_v4 = vld [vmem:[%s3507_s27 + $0x20] sm:$0xf] }
  0x23   : > { %v1032_v49 = vor.u32 %v1031_v39, %v1027_v37  ;;  %v1165_v50 = vrot.slane %v1163_v40, 1  ;;  %v1128_v51 = vshll.u32 %v2817_v41, 16  ;;  %v2825_v55 = vcombine.low %v2822_v47, %v2821_v24  ;;  %v2852_v5 = vld [vmem:[%s3507_s27 + $0x24] sm:$0x3]  ;;  %v2838_v6 = vld [vmem:[%s3507_s27 + $0x28] sm:$0xe] }
  0x24   : > { %v1038_v54 = vrot.slane %v2803_v44, 1  ;;  %v1126_v59 = vshrl.u32 %v2817_v41, 16  ;;  %v1312_v63 = vshll.u32 %v2840_v53, 16  ;;  %v2860_v14 = vld [vmem:[%s3507_s27 + $0x28] sm:$0xe]  ;;  %v2841_v18 = vcombine.low %v2838_v6, %v2837_v46 }
  0x25   : > { %601 = vrot.lane.b32.xlu0 %v600_v56, %s3444_s28  ;;  %v3603_v56 = vld [vmem:[%s3507_s27 + $0x28] sm:$0xf]  ;;  %v1130_v61 = vrot.slane %v1128_v51, 1  ;;  %v1172_v2 = vrot.slane %v2825_v55, 1  ;;  %v3620_v19 = vld [vmem:[%s3507_s27 + $0x30] sm:$0xf]  ;;  %v2863_v24 = vcombine.low %v2860_v14, %v2859_v57 }
  0x26   : > { %607 = vrot.lane.b32.xlu1 %v606_v60, %s3445_s29  ;;  %v1166_v60 = vor.u32 %v1165_v50, %v1161_v48  ;;  %v2862_v1 = vcombine.low %v3603_v56, %v2859_v57  ;;  %v1314_v12 = vrot.slane %v1312_v63, 1  ;;  %v2853_v25 = vld [vmem:[%s3507_s27 + $0x20] sm:$0xe]  ;;  %v1321_v31 = vrot.slane %v2841_v18, 1  ;;  %v2897_v33 = vld [vmem:[%s3507_s27 + $0x34] sm:$0x3] }
  0x27   : > { %v1131_v10 = vor.u32 %v1130_v61, %v1126_v59  ;;  %v2856_v37 = vcombine.low %v2853_v25, %v2852_v5  ;;  %v3636_v44 = vld [vmem:[%s3507_s27 + $0x28] sm:$0xf]  ;;  %v2890_v46 = vld [vmem:[%s3507_s27 + $0x2c] sm:$0x3]  ;;  %v2898_v50 = vld [vmem:[%s3507_s27 + $0x30] sm:$0xe] }
  0x28   : > { %v1446_v13 = vshll.u32 %v2862_v1, 16  ;;  %v1444_v22 = vshrl.u32 %v2862_v1, 16  ;;  %v2893_v55 = vcombine.low %v3636_v44, %v2890_v46  ;;  %v3644_v57 = vld [vmem:[%s3507_s27 + $0x38] sm:$0xf]  ;;  %v2901_v61 = vcombine.low %v2898_v50, %v2897_v33  ;;  %v2891_v63 = vld [vmem:[%s3507_s27 + $0x28] sm:$0xe] }
  0x29   : > { %566 = vrot.lane.b32.xlu0 %v565_v3, %s3444_s28  ;;  %v2818_v3 = vcombine.low %v2815_v58, %v2814_v35  ;;  %v1455_v35 = vrot.slane %v2863_v24, 1  ;;  %v1420_v47 = vrot.slane %v2856_v37, 1  ;;  %v2913_v58 = vld [vmem:[%s3507_s27 + $0x3c] sm:$0x3]  ;;  %v3652_v6 = vld [vmem:[%s3507_s27 + $0x38] sm:$0xf] }
  0x2a   : > { %572 = vrot.lane.b32.xlu1 %v571_v8, %s3445_s29  ;;  %v1310_v8 = vshrl.u32 %v2840_v53, 16  ;;  %v2914_v14 = vld [vmem:[%s3507_s27 + $0x38] sm:$0xe]  ;;  %v2928_v24 = vld [vmem:[%s3507_s27 + $0x34] sm:$0x3] }
  0x2b   : > { %v1137_v17 = vrot.slane %v2818_v3, 1  ;;  %v1694_v3 = vshll.u32 %v2893_v55, 16  ;;  %v2951_v37 = vld [vmem:[%s3507_s27 + $0x44] sm:$0x3] }
  0x2c   : > { %v1315_v26 = vor.u32 %v1314_v12, %v1310_v8  ;;  %v2935_v8 = vld [vmem:[%s3507_s27 + $0x3c] sm:$0x3]  ;;  %v1692_v12 = vshrl.u32 %v2893_v55, 16  ;;  %v2973_v50 = vld [vmem:[%s3507_s27 + $0x44] sm:$0x3] }
  0x2d   : > { %750 = vrot.lane.b32.xlu0 %v749_v16, %s3444_s28  ;;  %v2855_v16 = vcombine.low %v3611_v4, %v2852_v5  ;;  %v2916_v5 = vcombine.low %v3644_v57, %v2913_v58 }
  0x2e   : > { %756 = vrot.lane.b32.xlu1 %v755_v21, %s3445_s29  ;;  %v2875_v21 = vld [vmem:[%s3507_s27 + $0x34] sm:$0x3] }
  0x2f   : > { %v1411_v28 = vshll.u32 %v2855_v16, 16  ;;  %v2878_v29 = vcombine.low %v3620_v19, %v2875_v21  ;;  %v1409_v36 = vshrl.u32 %v2855_v16, 16  ;;  %v1878_v18 = vshll.u32 %v2916_v5, 16 }
  0x31   : > { %884 = vrot.lane.b32.xlu0 %v883_v27, %s3444_s28  ;;  %v1448_v27 = vrot.slane %v1446_v13, 1  ;;  %v1413_v40 = vrot.slane %v1411_v28, 1  ;;  %v1595_v41 = vshll.u32 %v2878_v29, 16  ;;  %v1593_v48 = vshrl.u32 %v2878_v29, 16  ;;  %v2936_v28 = vld [vmem:[%s3507_s27 + $0x38] sm:$0xe] }
  0x32   : > { %890 = vrot.lane.b32.xlu1 %v889_v32, %s3445_s29  ;;  %v3628_v32 = vld [vmem:[%s3507_s27 + $0x30] sm:$0xf]  ;;  %v2894_v13 = vcombine.low %v2891_v63, %v2890_v46  ;;  %v2966_v63 = vld [vmem:[%s3507_s27 + $0x3c] sm:$0x3] }
  0x33   : > { %v1449_v39 = vor.u32 %v1448_v27, %v1444_v22  ;;  %v1414_v51 = vor.u32 %v1413_v40, %v1409_v36  ;;  %v1597_v53 = vrot.slane %v1595_v41, 1  ;;  %v3660_v22 = vld [vmem:[%s3507_s27 + $0x30] sm:$0xf]  ;;  %v2917_v27 = vcombine.low %v2914_v14, %v2913_v58  ;;  %v3668_v36 = vld [vmem:[%s3507_s27 + $0x40] sm:$0xf] }
  0x34   : > { %v1703_v25 = vrot.slane %v2894_v13, 1  ;;  %v2939_v40 = vcombine.low %v2936_v28, %v2935_v8  ;;  %v2929_v41 = vld [vmem:[%s3507_s27 + $0x30] sm:$0xe]  ;;  %v3691_v14 = vld [vmem:[%s3507_s27 + $0x48] sm:$0xf] }
  0x35   : > { %849 = vrot.lane.b32.xlu0 %v848_v38, %s3444_s28  ;;  %v2876_v38 = vld [vmem:[%s3507_s27 + $0x30] sm:$0xe]  ;;  %v1598_v1 = vor.u32 %v1597_v53, %v1593_v48  ;;  %v2954_v48 = vcombine.low %v3668_v36, %v2951_v37 }
  0x36   : > { %855 = vrot.lane.b32.xlu1 %v854_v43, %s3445_s29  ;;  %v2900_v43 = vcombine.low %v3628_v32, %v2897_v33 }
  0x39   : > { %1033 = vrot.lane.b32.xlu0 %v1032_v49, %s3444_s28  ;;  %v2879_v49 = vcombine.low %v2876_v38, %v2875_v21  ;;  %v2938_v21 = vcombine.low %v3652_v6, %v2935_v8  ;;  %v1887_v38 = vrot.slane %v2917_v27, 1 }
  0x3a   : > { %1039 = vrot.lane.b32.xlu1 %v1038_v54, %s3445_s29  ;;  %v1729_v54 = vshll.u32 %v2900_v43, 16 }
  0x3b   : > { %v1604_v59 = vrot.slane %v2879_v49, 1  ;;  %v2012_v33 = vshll.u32 %v2938_v21, 16  ;;  %v3676_v49 = vld [vmem:[%s3507_s27 + $0x40] sm:$0xf] }
  0x3d   : > { %1167 = vrot.lane.b32.xlu0 %v1166_v60, %s3444_s28  ;;  %v1727_v60 = vshrl.u32 %v2900_v43, 16  ;;  %v2014_v46 = vrot.slane %v2012_v33, 1 }
  0x3e   : > { %1173 = vrot.lane.b32.xlu1 %v1172_v2, %s3445_s29  ;;  %v1731_v2 = vrot.slane %v1729_v54, 1  ;;  %v2932_v54 = vcombine.low %v2929_v41, %v2928_v24 }
  0x40   : > { %v1732_v16 = vor.u32 %v1731_v2, %v1727_v60  ;;  %v2976_v60 = vcombine.low %v3676_v49, %v2973_v50  ;;  %v1986_v2 = vrot.slane %v2932_v54, 1  ;;  %v2707_v54 = vld [vmem:[%s3507_s27 + $0xc] sm:$0x1] }
  0x41   : > { %1132 = vrot.lane.b32.xlu0 %v1131_v10, %s3444_s28  ;;  %v1738_v10 = vrot.slane %v2901_v61, 1  ;;  %v3683_v61 = vld [vmem:[%s3507_s27 + $0x38] sm:$0xf] }
  0x42   : > { %1138 = vrot.lane.b32.xlu1 %v1137_v17, %s3445_s29  ;;  %v1696_v17 = vrot.slane %v1694_v3, 1  ;;  %v2159_v3 = vshrl.u32 %v2954_v48, 16 }
  0x44   : > { %v1697_v29 = vor.u32 %v1696_v17, %v1692_v12  ;;  %v2969_v12 = vcombine.low %v3683_v61, %v2966_v63  ;;  %v2974_v17 = vld [vmem:[%s3507_s27 + $0x40] sm:$0xe] }
  0x45   : > { %1316 = vrot.lane.b32.xlu0 %v1315_v26, %s3444_s28  ;;  %v1876_v26 = vshrl.u32 %v2916_v5, 16  ;;  %v2977_v28 = vcombine.low %v2974_v17, %v2973_v50  ;;  %v2744_v17 = vld [vmem:[%s3507_s27 + $0x14] sm:$0x1] }
  0x46   : > { %1322 = vrot.lane.b32.xlu1 %v1321_v31, %s3445_s29  ;;  %v1880_v31 = vrot.slane %v1878_v18, 1  ;;  %v2293_v18 = vshrl.u32 %v2976_v60, 16 }
  0x48   : > { %v1881_v43 = vor.u32 %v1880_v31, %v1876_v26  ;;  %v2258_v31 = vshrl.u32 %v2969_v12, 16 }
  0x49   : > { %1450 = vrot.lane.b32.xlu0 %v1449_v39, %s3444_s28  ;;  %v2010_v39 = vshrl.u32 %v2938_v21, 16 }
  0x4a   : > { %1456 = vrot.lane.b32.xlu1 %v1455_v35, %s3445_s29  ;;  %v2931_v35 = vcombine.low %v3660_v22, %v2928_v24 }
  0x4b   : > { %v2015_v55 = vor.u32 %v2014_v46, %v2010_v39 }
  0x4c   : > { %v1975_v53 = vshrl.u32 %v2931_v35, 16 }
  0x4d   : > { %1415 = vrot.lane.b32.xlu0 %v1414_v51, %s3444_s28  ;;  %v2021_v51 = vrot.slane %v2939_v40, 1  ;;  %v2990_v40 = vld [vmem:[%s3507_s27 + $0x48] sm:$0xe] }
  0x4e   : > { %1421 = vrot.lane.b32.xlu1 %v1420_v47, %s3445_s29  ;;  %v1977_v47 = vshll.u32 %v2931_v35, 16 }
  0x50   : > { %v1979_v58 = vrot.slane %v1977_v47, 1 }
  0x51   : > { %1599 = vrot.lane.b32.xlu0 %v1598_v1, %s3444_s28  ;;  %v2952_v1 = vld [vmem:[%s3507_s27 + $0x40] sm:$0xe] }
  0x52   : > { %1605 = vrot.lane.b32.xlu1 %v1604_v59, %s3445_s29  ;;  %v2161_v59 = vshll.u32 %v2954_v48, 16  ;;  %v1980_v5 = vor.u32 %v1979_v58, %v1975_v53  ;;  %v2955_v13 = vcombine.low %v2952_v1, %v2951_v37  ;;  %v249_v53 = vld [vmem:[%s3507_s27 + $0x4] sm:$0x1]  ;;  %v3354_v1 = vld [vmem:[%s4137_s1 + $0x14] ss:$0 sps:$4 sm:$0xff]  }
  0x54   : > { %v2163_v8 = vrot.slane %v2161_v59, 1  ;;  %v2170_v27 = vrot.slane %v2955_v13, 1  ;;  %v2710_v59 = vcombine.low %v3511_v7, %v2707_v54  ;;  %v2782_v54 = vld [vmem:[%s3507_s27 + $0x1c] sm:$0x1] }
  0x55   : > { %1733 = vrot.lane.b32.xlu0 %v1732_v16, %s3444_s28  ;;  %v2989_v16 = vld [vmem:[%s3507_s27 + $0x4c] sm:$0x3] }
  0x56   : > { %1739 = vrot.lane.b32.xlu1 %v1738_v10, %s3445_s29  ;;  %v2295_v10 = vshll.u32 %v2976_v60, 16  ;;  %v2164_v21 = vor.u32 %v2163_v8, %v2159_v3  ;;  %v2992_v26 = vcombine.low %v3691_v14, %v2989_v16  ;;  %v2993_v48 = vcombine.low %v2990_v40, %v2989_v16  ;;  %v3352_v60 = vld [vmem:[%s4137_s1 + $0x20] ss:$0 sps:$4 sm:$0xff]   ;;  %v2723_v3 = vld [vmem:[%s3507_s27 + $0x14] sm:$0x1] }
  0x57   : > { %v489_v7 = vsel %vm337_vm0, %v3352_v60, 0  ;;  %v2726_v16 = vcombine.low %v3523_v15, %v2723_v3  ;;  %v3358_v15 = vld [vmem:[%s4137_s1 + $0x8] ss:$0 sps:$4 sm:$0xff]   ;;  %v2775_v3 = vld [vmem:[%s3507_s27 + $0x14] sm:$0x1] }
  0x58   : > { %v2297_v24 = vrot.slane %v2295_v10, 1  ;;  %v2444_v37 = vshll.u32 %v2992_v26, 16 }
  0x59   : > { %1698 = vrot.lane.b32.xlu0 %v1697_v29, %s3444_s28  ;;  %v2967_v29 = vld [vmem:[%s3507_s27 + $0x38] sm:$0xe] }
  0x5a   : > { %1704 = vrot.lane.b32.xlu1 %v1703_v25, %s3445_s29  ;;  %v2260_v25 = vshll.u32 %v2969_v12, 16  ;;  %v2298_v33 = vor.u32 %v2297_v24, %v2293_v18  ;;  %v2970_v39 = vcombine.low %v2967_v29, %v2966_v63  ;;  %v2446_v46 = vrot.slane %v2444_v37, 1  ;;  %v3355_v18 = vld [vmem:[%s4137_s1 + $0x18] sm:$0xff]   ;;  %v3357_v24 = vld [vmem:[%s4137_s1 + $0xc] sm:$0xff]  }
  0x5b   : > { %v629_v12 = vsel %vm337_vm0, %v3354_v1, 0  ;;  %v2737_v29 = vld [vmem:[%s3507_s27 + $0xc] sm:$0x1] }
  0x5c   : > { %v2262_v35 = vrot.slane %v2260_v25, 1  ;;  %v2269_v47 = vrot.slane %v2970_v39, 1  ;;  %v2740_v40 = vcombine.low %v3535_v30, %v2737_v29  ;;  %v3364_v30 = vld [vmem:[%s4137_s1 + $0x14] ss:$0 sps:$4 sm:$0xff]  }
  0x5d   : > { %1882 = vrot.lane.b32.xlu0 %v1881_v43, %s3444_s28  ;;  %v2442_v43 = vshrl.u32 %v2992_v26, 16  ;;  %v2747_v26 = vcombine.low %v3529_v20, %v2744_v17  ;;  %v684_v20 = vsel %vm337_vm0, %v3358_v15, 0 }
  0x5e   : > { %1888 = vrot.lane.b32.xlu1 %v1887_v38, %s3445_s29  ;;  %v2304_v38 = vrot.slane %v2977_v28, 1  ;;  %v2263_v41 = vor.u32 %v2262_v35, %v2258_v31 }
  0x5f   : > { %v2447_v50 = vor.u32 %v2446_v46, %v2442_v43  ;;  %v3361_v43 = vld [vmem:[%s4137_s1] sm:$0xff]  }
  0x61   : > { %2016 = vrot.lane.b32.xlu0 %v2015_v55, %s3444_s28  ;;  %v2703_v55 = vcombine.low %v3515_v9, %v249_v53 }
  0x62   : > { %2022 = vrot.lane.b32.xlu1 %v2021_v51, %s3445_s29  ;;  %v2453_v51 = vrot.slane %v2993_v48, 1 }
  0x65   : > { %1981 = vrot.lane.b32.xlu0 %v1980_v5, %s3444_s28 }
  0x66   : > { %1987 = vrot.lane.b32.xlu1 %v1986_v2, %s3445_s29 }
  0x69   : > { %2165 = vrot.lane.b32.xlu0 %v2164_v21, %s3444_s28 }
  0x6a   : > { %2171 = vrot.lane.b32.xlu1 %v2170_v27, %s3445_s29  ;;  %v3360_v27 = vld [vmem:[%s4137_s1 + $0x20] ss:$0 sps:$4 sm:$0xff]  }
  0x6d   : > { %2299 = vrot.lane.b32.xlu0 %v2298_v33, %s3444_s28 }
  0x6e   : > { %2305 = vrot.lane.b32.xlu1 %v2304_v38, %s3445_s29  ;;  %v778_v38 = vsel %vm337_vm0, %v3360_v27, 0  ;;  %v2820_v27 = vld [vmem:[%s3507_s27 + $0x24] sm:$0x1] }
  0x71   : > { %2264 = vrot.lane.b32.xlu0 %v2263_v41, %s3444_s28  ;;  %v2760_v41 = vld [vmem:[%s3507_s27 + $0x1c] sm:$0x1] }
  0x72   : > { %2270 = vrot.lane.b32.xlu1 %v2269_v47, %s3445_s29  ;;  %v3363_v47 = vld [vmem:[%s4137_s1 + $0x18] sm:$0xff]  }
  0x75   : > { %2448 = vrot.lane.b32.xlu0 %v2447_v50, %s3444_s28  ;;  %v2763_v50 = vcombine.low %v3547_v42, %v2760_v41  ;;  %v912_v42 = vsel %vm337_vm0, %v3364_v30, 0 }
  0x76   : > { %2454 = vrot.lane.b32.xlu1 %v2453_v51, %s3445_s29  ;;  %v3366_v51 = vld [vmem:[%s4137_s1 + $0x8] ss:$0 sps:$4 sm:$0xff]  }
  0x8b   : > { %v309_v58 = vpop.permute.xlu0 %308 }
  0x8c   : > { %v268_v63 = vpop.permute.xlu1 %267  ;;  %v318_v9 = vsel %vm275_vm2, %v2710_v59, %v309_v58 }
  0x8d   : > { %v278_v2 = vsel %vm275_vm2, %v2703_v55, %v268_v63  ;;  %v967_v63 = vsel %vm337_vm0, %v3366_v51, 0 }
  0x8f   : > { %v315_v5 = vpop.permute.xlu0 %314 }
  0x90   : > { %v320_v8 = vsel %vm279_vm3, %v318_v9, %v315_v5  ;;  %v274_v10 = vpop.permute.xlu1 %273  ;;  %v3367_v9 = vld [vmem:[%s4137_s1 + $0xc] sm:$0xff]  }
  0x91   : > { %v281_v13 = vsel %vm279_vm3, %v278_v2, %v274_v10  ;;  %3082 = vmatmul.mubr.msk.bf16.vlgmr.msra.gmra.mxu0 %vm334_vm4, %v320_v8  ;;  %v2785_v2 = vcombine.low %v3555_v52, %v2782_v54  ;;  %v3370_v52 = vld [vmem:[%s4137_s1 + $0x20] ss:$0 sps:$4 sm:$0xff]   ;;  %v2778_v10 = vcombine.low %v3563_v62, %v2775_v3 }
  0x92   : > { %3090 = vmatmul.mubr.msk.bf16.vlgmr.msra.gmra.mxu1 %vm334_vm4, %v281_v13  ;;  %3094 = vmatpush3.bf16.msra.mxu0 %v489_v7  ;;  %v3369_v7 = vld [vmem:[%s4137_s1] sm:$0xff]   ;;  %v1061_v62 = vsel %vm337_vm0, %v3370_v52, 0  ;;  %v3385_v52 = vld [vmem:[%s4137_s1 + $0xc] sm:$0xff]  }
  0x93   : > { %v461_v21 = vpop.permute.xlu0 %460  ;;  %3102 = vmatpush3.bf16.msra.mxu1 %v629_v12  ;;  %3095 = vmatprep.subr.bf16.mxu0 %v3442_v0  ;;  %v3372_v12 = vld [vmem:[%s4137_s1 + $0x14] ss:$0 sps:$4 sm:$0xff]  }
  0x94   : > { %v467_v25 = vpop.permute.xlu1 %466  ;;  %3103 = vmatprep.subr.bf16.mxu1 %v3442_v0  ;;  %3097 = vmatprep.mubr.msk.bf16.mxu0 %vm3443_vm1, %v3442_v0  ;;  %v470_v28 = vsel %vm275_vm2, %v2726_v16, %v461_v21  ;;  %v2798_v16 = vld [vmem:[%s3507_s27 + $0x24] sm:$0x1]  ;;  %v1195_v15 = vsel %vm337_vm0, %v3372_v12, 0 }
  0x95   : > { %3105 = vmatprep.mubr.msk.bf16.mxu1 %vm3443_vm1, %v3442_v0  ;;  %v472_v33 = vsel %vm279_vm3, %v470_v28, %v467_v25  ;;  %v3373_v28 = vld [vmem:[%s4137_s1 + $0x18] sm:$0xff]  }
  0x96   : > { %3096 = vmatpush3.bf16.msra.mxu0 %v3355_v18 }
  0x97   : > { %v602_v31 = vpop.permute.xlu0 %601  ;;  %3104 = vmatpush3.bf16.msra.mxu1 %v3357_v24  ;;  %3109 = vmatprep.subr.bf16.mxu0 %v3442_v0 }
  0x98   : > { %v611_v35 = vsel %vm275_vm2, %v2747_v26, %v602_v31  ;;  %v608_v37 = vpop.permute.xlu1 %607  ;;  %3117 = vmatprep.subr.bf16.mxu1 %v3442_v0  ;;  %v2801_v26 = vcombine.low %v3571_v11, %v2798_v16  ;;  %v3375_v31 = vld [vmem:[%s4137_s1 + $0xc] sm:$0xff]   ;;  %v3376_v11 = vld [vmem:[%s4137_s1 + $0x8] ss:$0 sps:$4 sm:$0xff]   ;;  %v3390_v16 = vld [vmem:[%s4137_s1 + $0x14] ss:$0 sps:$4 sm:$0xff]  }
  0x99   : > { %v613_v39 = vsel %vm279_vm3, %v611_v35, %v608_v37  ;;  %3098 = vmatmul.mubr.msk.bf16.vlgmr.msra.gmra.mxu0 %vm334_vm4, %v472_v33  ;;  %v2823_v33 = vcombine.low %v3579_v23, %v2820_v27  ;;  %v3378_v35 = vld [vmem:[%s4137_s1 + $0x20] ss:$0 sps:$4 sm:$0xff]   ;;  %v1250_v23 = vsel %vm337_vm0, %v3376_v11, 0  ;;  %v3393_v11 = vld [vmem:[%s4137_s1 + $0xc] sm:$0xff]  }
  0x9a   : > { %3110 = vmatpush3.bf16.msra.mxu0 %v684_v20  ;;  %3106 = vmatmul.mubr.msk.bf16.vlgmr.msra.gmra.mxu1 %vm334_vm4, %v613_v39 }
  0x9b   : > { %v567_v46 = vpop.permute.xlu0 %566  ;;  %3118 = vmatpush3.bf16.msra.mxu1 %v778_v38  ;;  %3111 = vmatprep.subr.bf16.mxu0 %v3442_v0  ;;  %v2813_v38 = vld [vmem:[%s3507_s27 + $0x1c] sm:$0x1] }
  0x9c   : > { %v573_v48 = vpop.permute.xlu1 %572  ;;  %3119 = vmatprep.subr.bf16.mxu1 %v3442_v0  ;;  %3113 = vmatprep.mubr.msk.bf16.mxu0 %vm3443_vm1, %v3442_v0  ;;  %v576_v53 = vsel %vm275_vm2, %v2740_v40, %v567_v46  ;;  %v1344_v46 = vsel %vm337_vm0, %v3378_v35, 0  ;;  %v2816_v30 = vcombine.low %v3587_v34, %v2813_v38  ;;  %v3382_v34 = vld [vmem:[%s4137_s1 + $0x14] ss:$0 sps:$4 sm:$0xff]   ;;  %v3396_v35 = vld [vmem:[%s4137_s1 + $0x20] ss:$0 sps:$4 sm:$0xff]  }
  0x9d   : > { %3121 = vmatprep.mubr.msk.bf16.mxu1 %vm3443_vm1, %v3442_v0  ;;  %v578_v58 = vsel %vm279_vm3, %v576_v53, %v573_v48  ;;  %v2836_v48 = vld [vmem:[%s3507_s27 + $0x2c] sm:$0x1]  ;;  %v3381_v53 = vld [vmem:[%s4137_s1 + $0x18] sm:$0xff]  }
  0x9e   : > { %3112 = vmatpush3.bf16.msra.mxu0 %v3361_v43  ;;  %v2889_v38 = vld [vmem:[%s3507_s27 + $0x2c] sm:$0x1] }
  0x9f   : > { %v751_v55 = vpop.permute.xlu0 %750  ;;  %3120 = vmatpush3.bf16.msra.mxu1 %v3363_v47  ;;  %3125 = vmatprep.subr.bf16.mxu0 %v3442_v0 }
  0xa0   : > { %v760_v59 = vsel %vm275_vm2, %v2763_v50, %v751_v55  ;;  %v757_v60 = vpop.permute.xlu1 %756  ;;  %3133 = vmatprep.subr.bf16.mxu1 %v3442_v0  ;;  %v3379_v50 = vld [vmem:[%s4137_s1] sm:$0xff]   ;;  %v2839_v55 = vcombine.low %v3595_v45, %v2836_v48  ;;  %v1478_v45 = vsel %vm337_vm0, %v3382_v34, 0 }
  0xa1   : > { %v762_v1 = vsel %vm279_vm3, %v760_v59, %v757_v60  ;;  %3114 = vmatmul.mubr.msk.bf16.vlgmr.msra.gmra.mxu0 %vm334_vm4, %v578_v58  ;;  %v2858_v59 = vld [vmem:[%s3507_s27 + $0x2c] sm:$0x1]  ;;  %v3397_v48 = vld [vmem:[%s4137_s1] sm:$0xff]  }
  0xa2   : > { %3126 = vmatpush3.bf16.msra.mxu0 %v912_v42  ;;  %3122 = vmatmul.mubr.msk.bf16.vlgmr.msra.gmra.mxu1 %vm334_vm4, %v762_v1  ;;  %v3384_v42 = vld [vmem:[%s4137_s1 + $0x8] ss:$0 sps:$4 sm:$0xff]  }
  0xa3   : > { %v885_v5 = vpop.permute.xlu0 %884  ;;  %3134 = vmatpush3.bf16.msra.mxu1 %v967_v63  ;;  %3127 = vmatprep.subr.bf16.mxu0 %v3442_v0  ;;  %v1533_v3 = vsel %vm337_vm0, %v3384_v42, 0  ;;  %v2934_v42 = vld [vmem:[%s3507_s27 + $0x3c] sm:$0x1] }
  0xa4   : > { %v891_v8 = vpop.permute.xlu1 %890  ;;  %3135 = vmatprep.subr.bf16.mxu1 %v3442_v0  ;;  %3129 = vmatprep.mubr.msk.bf16.mxu0 %vm3443_vm1, %v3442_v0  ;;  %v894_v13 = vsel %vm275_vm2, %v2785_v2, %v885_v5  ;;  %v2861_v5 = vcombine.low %v3603_v56, %v2858_v59  ;;  %v3388_v56 = vld [vmem:[%s4137_s1 + $0x20] ss:$0 sps:$4 sm:$0xff]  }
  0xa5   : > { %3137 = vmatprep.mubr.msk.bf16.mxu1 %vm3443_vm1, %v3442_v0  ;;  %v896_v18 = vsel %vm279_vm3, %v894_v13, %v891_v8 }
  0xa6   : > { %3128 = vmatpush3.bf16.msra.mxu0 %v3367_v9 }
  0xa7   : > { %v850_v17 = vpop.permute.xlu0 %849  ;;  %3136 = vmatpush3.bf16.msra.mxu1 %v3369_v7  ;;  %3141 = vmatprep.subr.bf16.mxu0 %v3442_v0  ;;  %v2851_v7 = vld [vmem:[%s3507_s27 + $0x24] sm:$0x1] }
  0xa8   : > { %v859_v21 = vsel %vm275_vm2, %v2778_v10, %v850_v17  ;;  %v856_v24 = vpop.permute.xlu1 %855  ;;  %3149 = vmatprep.subr.bf16.mxu1 %v3442_v0  ;;  %v3387_v10 = vld [vmem:[%s4137_s1] sm:$0xff]   ;;  %v2854_v13 = vcombine.low %v3611_v4, %v2851_v7  ;;  %v1627_v4 = vsel %vm337_vm0, %v3388_v56, 0 }
  0xa9   : > { %v861_v25 = vsel %vm279_vm3, %v859_v21, %v856_v24  ;;  %3130 = vmatmul.mubr.msk.bf16.vlgmr.msra.gmra.mxu0 %vm334_vm4, %v896_v18  ;;  %v3405_v7 = vld [vmem:[%s4137_s1] sm:$0xff]  }
  0xaa   : > { %3142 = vmatpush3.bf16.msra.mxu0 %v1061_v62  ;;  %3138 = vmatmul.mubr.msk.bf16.vlgmr.msra.gmra.mxu1 %vm334_vm4, %v861_v25  ;;  %v2874_v62 = vld [vmem:[%s3507_s27 + $0x34] sm:$0x1]  ;;  %v1761_v25 = vsel %vm337_vm0, %v3390_v16, 0 }
  0xab   : > { %v1034_v29 = vpop.permute.xlu0 %1033  ;;  %3150 = vmatpush3.bf16.msra.mxu1 %v1195_v15  ;;  %3143 = vmatprep.subr.bf16.mxu0 %v3442_v0  ;;  %v2877_v27 = vcombine.low %v3620_v19, %v2874_v62  ;;  %v3394_v19 = vld [vmem:[%s4137_s1 + $0x8] ss:$0 sps:$4 sm:$0xff]  }
  0xac   : > { %v1040_v20 = vpop.permute.xlu1 %1039  ;;  %3151 = vmatprep.subr.bf16.mxu1 %v3442_v0  ;;  %3145 = vmatprep.mubr.msk.bf16.mxu0 %vm3443_vm1, %v3442_v0  ;;  %v1043_v37 = vsel %vm275_vm2, %v2801_v26, %v1034_v29  ;;  %v3391_v29 = vld [vmem:[%s4137_s1 + $0x18] sm:$0xff]  }
  0xad   : > { %3153 = vmatprep.mubr.msk.bf16.mxu1 %vm3443_vm1, %v3442_v0  ;;  %v1045_v40 = vsel %vm279_vm3, %v1043_v37, %v1040_v20 }
  0xae   : > { %3144 = vmatpush3.bf16.msra.mxu0 %v3373_v28  ;;  %v2896_v28 = vld [vmem:[%s3507_s27 + $0x34] sm:$0x1] }
  0xaf   : > { %v1168_v39 = vpop.permute.xlu0 %1167  ;;  %3152 = vmatpush3.bf16.msra.mxu1 %v3375_v31  ;;  %3157 = vmatprep.subr.bf16.mxu0 %v3442_v0 }
  0xb0   : > { %v1177_v41 = vsel %vm275_vm2, %v2823_v33, %v1168_v39  ;;  %v1174_v43 = vpop.permute.xlu1 %1173  ;;  %3165 = vmatprep.subr.bf16.mxu1 %v3442_v0  ;;  %v2899_v33 = vcombine.low %v3628_v32, %v2896_v28  ;;  %v1816_v32 = vsel %vm337_vm0, %v3394_v19, 0 }
  0xb1   : > { %v1179_v47 = vsel %vm279_vm3, %v1177_v41, %v1174_v43  ;;  %3146 = vmatmul.mubr.msk.bf16.vlgmr.msra.gmra.mxu0 %vm334_vm4, %v1045_v40  ;;  %v1910_v43 = vsel %vm337_vm0, %v3396_v35, 0 }
  0xb2   : > { %3158 = vmatpush3.bf16.msra.mxu0 %v1250_v23  ;;  %3154 = vmatmul.mubr.msk.bf16.vlgmr.msra.gmra.mxu1 %vm334_vm4, %v1179_v47  ;;  %v2892_v47 = vcombine.low %v3636_v44, %v2889_v38  ;;  %v3400_v44 = vld [vmem:[%s4137_s1 + $0x14] ss:$0 sps:$4 sm:$0xff]  }
  0xb3   : > { %v1133_v51 = vpop.permute.xlu0 %1132  ;;  %3166 = vmatpush3.bf16.msra.mxu1 %v1344_v46  ;;  %3159 = vmatprep.subr.bf16.mxu0 %v3442_v0 }
  0xb4   : > { %v1139_v54 = vpop.permute.xlu1 %1138  ;;  %3167 = vmatprep.subr.bf16.mxu1 %v3442_v0  ;;  %3161 = vmatprep.mubr.msk.bf16.mxu0 %vm3443_vm1, %v3442_v0  ;;  %v1142_v58 = vsel %vm275_vm2, %v2816_v30, %v1133_v51  ;;  %v2912_v30 = vld [vmem:[%s3507_s27 + $0x3c] sm:$0x1] }
  0xb5   : > { %3169 = vmatprep.mubr.msk.bf16.mxu1 %vm3443_vm1, %v3442_v0  ;;  %v1144_v63 = vsel %vm279_vm3, %v1142_v58, %v1139_v54  ;;  %v3399_v51 = vld [vmem:[%s4137_s1 + $0x18] sm:$0xff]   ;;  %v2915_v34 = vcombine.low %v3644_v57, %v2912_v30  ;;  %v3402_v54 = vld [vmem:[%s4137_s1 + $0x8] ss:$0 sps:$4 sm:$0xff]   ;;  %v2044_v57 = vsel %vm337_vm0, %v3400_v44, 0 }
  0xb6   : > { %3160 = vmatpush3.bf16.msra.mxu0 %v3379_v50 }
  0xb7   : > { %v1317_v60 = vpop.permute.xlu0 %1316  ;;  %3168 = vmatpush3.bf16.msra.mxu1 %v3381_v53  ;;  %3173 = vmatprep.subr.bf16.mxu0 %v3442_v0 }
  0xb8   : > { %v1326_v1 = vsel %vm275_vm2, %v2839_v55, %v1317_v60  ;;  %v1323_v2 = vpop.permute.xlu1 %1322  ;;  %3181 = vmatprep.subr.bf16.mxu1 %v3442_v0 }
  0xb9   : > { %v1328_v9 = vsel %vm279_vm3, %v1326_v1, %v1323_v2  ;;  %3162 = vmatmul.mubr.msk.bf16.vlgmr.msra.gmra.mxu0 %vm334_vm4, %v1144_v63  ;;  %v2099_v63 = vsel %vm337_vm0, %v3402_v54, 0  ;;  %v2937_v2 = vcombine.low %v3652_v6, %v2934_v42  ;;  %v3406_v6 = vld [vmem:[%s4137_s1 + $0x20] ss:$0 sps:$4 sm:$0xff]  }
  0xba   : > { %3174 = vmatpush3.bf16.msra.mxu0 %v1478_v45  ;;  %3170 = vmatmul.mubr.msk.bf16.vlgmr.msra.gmra.mxu1 %vm334_vm4, %v1328_v9  ;;  %v3403_v9 = vld [vmem:[%s4137_s1 + $0xc] sm:$0xff]  }
  0xbb   : > { %v1451_v8 = vpop.permute.xlu0 %1450  ;;  %3182 = vmatpush3.bf16.msra.mxu1 %v1533_v3  ;;  %3175 = vmatprep.subr.bf16.mxu0 %v3442_v0  ;;  %v2927_v3 = vld [vmem:[%s3507_s27 + $0x34] sm:$0x1] }
  0xbc   : > { %v1457_v12 = vpop.permute.xlu1 %1456  ;;  %3183 = vmatprep.subr.bf16.mxu1 %v3442_v0  ;;  %3177 = vmatprep.mubr.msk.bf16.mxu0 %vm3443_vm1, %v3442_v0  ;;  %v1460_v17 = vsel %vm275_vm2, %v2861_v5, %v1451_v8  ;;  %v2930_v8 = vcombine.low %v3660_v22, %v2927_v3  ;;  %v2193_v22 = vsel %vm337_vm0, %v3406_v6, 0 }
  0xbd   : > { %3185 = vmatprep.mubr.msk.bf16.mxu1 %vm3443_vm1, %v3442_v0  ;;  %v1462_v21 = vsel %vm279_vm3, %v1460_v17, %v1457_v12  ;;  %v2950_v12 = vld [vmem:[%s3507_s27 + $0x44] sm:$0x1] }
  0xbe   : > { %3176 = vmatpush3.bf16.msra.mxu0 %v3385_v52 }
  0xbf   : > { %v1416_v18 = vpop.permute.xlu0 %1415  ;;  %3184 = vmatpush3.bf16.msra.mxu1 %v3387_v10  ;;  %3189 = vmatprep.subr.bf16.mxu0 %v3442_v0  ;;  %v3408_v10 = vld [vmem:[%s4137_s1 + $0x14] ss:$0 sps:$4 sm:$0xff]  }
  0xc0   : > { %v1425_v24 = vsel %vm275_vm2, %v2854_v13, %v1416_v18  ;;  %v1422_v15 = vpop.permute.xlu1 %1421  ;;  %3197 = vmatprep.subr.bf16.mxu1 %v3442_v0  ;;  %v2327_v18 = vsel %vm337_vm0, %v3408_v10, 0 }
  0xc1   : > { %v1427_v26 = vsel %vm279_vm3, %v1425_v24, %v1422_v15  ;;  %3178 = vmatmul.mubr.msk.bf16.vlgmr.msra.gmra.mxu0 %vm334_vm4, %v1462_v21  ;;  %v2953_v21 = vcombine.low %v3668_v36, %v2950_v12  ;;  %v2972_v24 = vld [vmem:[%s3507_s27 + $0x44] sm:$0x1]  ;;  %v3409_v15 = vld [vmem:[%s4137_s1 + $0x18] sm:$0xff]   ;;  %v3412_v36 = vld [vmem:[%s4137_s1 + $0x8] ss:$0 sps:$4 sm:$0xff]  }
  0xc2   : > { %3190 = vmatpush3.bf16.msra.mxu0 %v1627_v4  ;;  %3186 = vmatmul.mubr.msk.bf16.vlgmr.msra.gmra.mxu1 %vm334_vm4, %v1427_v26  ;;  %v3411_v26 = vld [vmem:[%s4137_s1 + $0xc] sm:$0xff]   ;;  %v2975_v28 = vcombine.low %v3676_v49, %v2972_v24  ;;  %v2382_v49 = vsel %vm337_vm0, %v3412_v36, 0 }
  0xc3   : > { %v1600_v31 = vpop.permute.xlu0 %1599  ;;  %3198 = vmatpush3.bf16.msra.mxu1 %v1761_v25  ;;  %3191 = vmatprep.subr.bf16.mxu0 %v3442_v0 }
  0xc4   : > { %v1606_v20 = vpop.permute.xlu1 %1605  ;;  %3199 = vmatprep.subr.bf16.mxu1 %v3442_v0  ;;  %3193 = vmatprep.mubr.msk.bf16.mxu0 %vm3443_vm1, %v3442_v0  ;;  %v1609_v37 = vsel %vm275_vm2, %v2877_v27, %v1600_v31 }
  0xc5   : > { %3201 = vmatprep.mubr.msk.bf16.mxu1 %vm3443_vm1, %v3442_v0  ;;  %v1611_v23 = vsel %vm279_vm3, %v1609_v37, %v1606_v20 }
  0xc6   : > { %3192 = vmatpush3.bf16.msra.mxu0 %v3391_v29  ;;  %v3414_v29 = vld [vmem:[%s4137_s1 + $0x20] ss:$0 sps:$4 sm:$0xff]  }
  0xc7   : > { %v1734_v39 = vpop.permute.xlu0 %1733  ;;  %3200 = vmatpush3.bf16.msra.mxu1 %v3393_v11  ;;  %3205 = vmatprep.subr.bf16.mxu0 %v3442_v0  ;;  %v2965_v11 = vld [vmem:[%s3507_s27 + $0x3c] sm:$0x1]  ;;  %v2476_v37 = vsel %vm337_vm0, %v3414_v29, 0 }
  0xc8   : > { %v1743_v40 = vsel %vm275_vm2, %v2899_v33, %v1734_v39  ;;  %v1740_v41 = vpop.permute.xlu1 %1739  ;;  %3213 = vmatprep.subr.bf16.mxu1 %v3442_v0  ;;  %v2968_v39 = vcombine.low %v3683_v61, %v2965_v11 }
  0xc9   : > { %v1745_v46 = vsel %vm279_vm3, %v1743_v40, %v1740_v41  ;;  %3194 = vmatmul.mubr.msk.bf16.vlgmr.msra.gmra.mxu0 %vm334_vm4, %v1611_v23  ;;  %v3415_v23 = vld [vmem:[%s4137_s1] sm:$0xff]   ;;  %v3417_v41 = vld [vmem:[%s4137_s1 + $0x18] sm:$0xff]  }
  0xca   : > { %3206 = vmatpush3.bf16.msra.mxu0 %v1816_v32  ;;  %3202 = vmatmul.mubr.msk.bf16.vlgmr.msra.gmra.mxu1 %vm334_vm4, %v1745_v46  ;;  %v2988_v32 = vld [vmem:[%s3507_s27 + $0x4c] sm:$0x1] }
  0xcb   : > { %v1699_v50 = vpop.permute.xlu0 %1698  ;;  %3214 = vmatpush3.bf16.msra.mxu1 %v1910_v43  ;;  %3207 = vmatprep.subr.bf16.mxu0 %v3442_v0  ;;  %v2991_v61 = vcombine.low %v3691_v14, %v2988_v32 }
  0xcc   : > { %v1705_v53 = vpop.permute.xlu1 %1704  ;;  %3215 = vmatprep.subr.bf16.mxu1 %v3442_v0  ;;  %3209 = vmatprep.mubr.msk.bf16.mxu0 %vm3443_vm1, %v3442_v0  ;;  %v1708_v55 = vsel %vm275_vm2, %v2892_v47, %v1699_v50 }
  0xcd   : > { %3217 = vmatprep.mubr.msk.bf16.mxu1 %vm3443_vm1, %v3442_v0  ;;  %v1710_v59 = vsel %vm279_vm3, %v1708_v55, %v1705_v53 }
  0xce   : > { %3208 = vmatpush3.bf16.msra.mxu0 %v3397_v48 }
  0xcf   : > { %v1883_v58 = vpop.permute.xlu0 %1882  ;;  %3216 = vmatpush3.bf16.msra.mxu1 %v3399_v51  ;;  %3221 = vmatprep.subr.bf16.mxu0 %v3442_v0 }
  0xd0   : > { %v1892_v60 = vsel %vm275_vm2, %v2915_v34, %v1883_v58  ;;  %v1889_v45 = vpop.permute.xlu1 %1888  ;;  %3229 = vmatprep.subr.bf16.mxu1 %v3442_v0 }
  0xd1   : > { %v1894_v1 = vsel %vm279_vm3, %v1892_v60, %v1889_v45  ;;  %3210 = vmatmul.mubr.msk.bf16.vlgmr.msra.gmra.mxu0 %vm334_vm4, %v1710_v59 }
  0xd2   : > { %3222 = vmatpush3.bf16.msra.mxu0 %v2044_v57  ;;  %3218 = vmatmul.mubr.msk.bf16.vlgmr.msra.gmra.mxu1 %vm334_vm4, %v1894_v1  ;;  %v4071_v57 = vld [vmem:[%s4138_s2] ss:$0 sm:$0xff] }
  0xd3   : > { %v2017_v5 = vpop.permute.xlu0 %2016  ;;  %3230 = vmatpush3.bf16.msra.mxu1 %v2099_v63  ;;  %3223 = vmatprep.subr.bf16.mxu0 %v3442_v0 }
  0xd4   : > { %v2023_v52 = vpop.permute.xlu1 %2022  ;;  %3231 = vmatprep.subr.bf16.mxu1 %v3442_v0  ;;  %3225 = vmatprep.mubr.msk.bf16.mxu0 %vm3443_vm1, %v3442_v0  ;;  %v2026_v56 = vsel %vm275_vm2, %v2937_v2, %v2017_v5 }
  0xd5   : > { %3233 = vmatprep.mubr.msk.bf16.mxu1 %vm3443_vm1, %v3442_v0  ;;  %v2028_v16 = vsel %vm279_vm3, %v2026_v56, %v2023_v52 }
  0xd6   : > { %3224 = vmatpush3.bf16.msra.mxu0 %v3403_v9 }
  0xd7   : > { %v1982_v13 = vpop.permute.xlu0 %1981  ;;  %3232 = vmatpush3.bf16.msra.mxu1 %v3405_v7  ;;  %3237 = vmatprep.subr.bf16.mxu0 %v3442_v0 }
  0xd8   : > { %v1991_v17 = vsel %vm275_vm2, %v2930_v8, %v1982_v13  ;;  %v1988_v62 = vpop.permute.xlu1 %1987  ;;  %3245 = vmatprep.subr.bf16.mxu1 %v3442_v0 }
  0xd9   : > { %v1993_v4 = vsel %vm279_vm3, %v1991_v17, %v1988_v62  ;;  %3226 = vmatmul.mubr.msk.bf16.vlgmr.msra.gmra.mxu0 %vm334_vm4, %v2028_v16 }
  0xda   : > { %3238 = vmatpush3.bf16.msra.mxu0 %v2193_v22  ;;  %3234 = vmatmul.mubr.msk.bf16.vlgmr.msra.gmra.mxu1 %vm334_vm4, %v1993_v4 }
  0xdb   : > { %v2166_v25 = vpop.permute.xlu0 %2165  ;;  %3246 = vmatpush3.bf16.msra.mxu1 %v2327_v18  ;;  %3239 = vmatprep.subr.bf16.mxu0 %v3442_v0 }
  0xdc   : > { %v2172_v27 = vpop.permute.xlu1 %2171  ;;  %3247 = vmatprep.subr.bf16.mxu1 %v3442_v0  ;;  %3241 = vmatprep.mubr.msk.bf16.mxu0 %vm3443_vm1, %v3442_v0  ;;  %v2175_v31 = vsel %vm275_vm2, %v2953_v21, %v2166_v25 }
  0xdd   : > { %3249 = vmatprep.mubr.msk.bf16.mxu1 %vm3443_vm1, %v3442_v0  ;;  %v2177_v20 = vsel %vm279_vm3, %v2175_v31, %v2172_v27 }
  0xde   : > { %3240 = vmatpush3.bf16.msra.mxu0 %v3409_v15 }
  0xdf   : > { %v2300_v19 = vpop.permute.xlu0 %2299  ;;  %3248 = vmatpush3.bf16.msra.mxu1 %v3411_v26  ;;  %3253 = vmatprep.subr.bf16.mxu0 %v3442_v0 }
  0xe0   : > { %v2309_v33 = vsel %vm275_vm2, %v2975_v28, %v2300_v19  ;;  %v2306_v35 = vpop.permute.xlu1 %2305  ;;  %3261 = vmatprep.subr.bf16.mxu1 %v3442_v0 }
  0xe1   : > { %v2311_v38 = vsel %vm279_vm3, %v2309_v33, %v2306_v35  ;;  %3242 = vmatmul.mubr.msk.bf16.vlgmr.msra.gmra.mxu0 %vm334_vm4, %v2177_v20 }
  0xe2   : > { %3254 = vmatpush3.bf16.msra.mxu0 %v2382_v49  ;;  %3250 = vmatmul.mubr.msk.bf16.vlgmr.msra.gmra.mxu1 %vm334_vm4, %v2311_v38 }
  0xe3   : > { %v2265_v40 = vpop.permute.xlu0 %2264  ;;  %3262 = vmatpush3.bf16.msra.mxu1 %v2476_v37  ;;  %3255 = vmatprep.subr.bf16.mxu0 %v3442_v0 }
  0xe4   : > { %v2271_v43 = vpop.permute.xlu1 %2270  ;;  %3263 = vmatprep.subr.bf16.mxu1 %v3442_v0  ;;  %3257 = vmatprep.mubr.msk.bf16.mxu0 %vm3443_vm1, %v3442_v0  ;;  %v2274_v46 = vsel %vm275_vm2, %v2968_v39, %v2265_v40 }
  0xe5   : > { %3265 = vmatprep.mubr.msk.bf16.mxu1 %vm3443_vm1, %v3442_v0  ;;  %v2276_v30 = vsel %vm279_vm3, %v2274_v46, %v2271_v43 }
  0xe6   : > { %3256 = vmatpush3.bf16.msra.mxu0 %v3415_v23 }
  0xe7   : > { %v2449_v47 = vpop.permute.xlu0 %2448  ;;  %3264 = vmatpush3.bf16.msra.mxu1 %v3417_v41 }
  0xe8   : > { %v2458_v48 = vsel %vm275_vm2, %v2991_v61, %v2449_v47  ;;  %v2455_v50 = vpop.permute.xlu1 %2454 }
  0xe9   : > { %v2460_v51 = vsel %vm279_vm3, %v2458_v48, %v2455_v50  ;;  %3258 = vmatmul.mubr.msk.bf16.vlgmr.msra.gmra.mxu0 %vm334_vm4, %v2276_v30 }
  0xea   : > { %3266 = vmatmul.mubr.msk.bf16.vlgmr.msra.gmra.mxu1 %vm334_vm4, %v2460_v51 }
 0x151   : > { %v375_v14 = vpop.f32.mrf.mxu0 }
 0x152   : > { %v430_v44 = vpop.f32.mrf.mxu1 }
 0x153   : > { %v3083_v53 = vpop.f32.mrf.mxu0  ;;  %v431_v42 = vadd.f32 %v430_v44, %v375_v14 }
 0x154   : > { %v3091_v34 = vpop.f32.mrf.mxu1 }
 0x155   : > { %v378_v0 = vpop.f32.mrf.mxu0 }
 0x156   : > { %v433_v54 = vpop.f32.mrf.mxu1 }
 0x157   : > { %v3084_v55 = vpop.f32.mrf.mxu0  ;;  %v434_v1 = vadd.f32 %v433_v54, %v378_v0 }
 0x158   : > { %v3092_v58 = vpop.f32.mrf.mxu1 }
 0x159   : > { %v525_v59 = vpop.f32.mrf.mxu0 }
 0x15a   : > { %v532_v60 = vadd.f32 %v525_v59, %v431_v42  ;;  %v665_v45 = vpop.f32.mrf.mxu1 }
 0x15b   : > { %v3099_v63 = vpop.f32.mrf.mxu0 }
 0x15c   : > { %v540_v2 = vadd.f32 %v4071_v57, %v532_v60  ;;  %v3107_v3 = vpop.f32.mrf.mxu1 }
 0x15d   : > { %v528_v9 = vpop.f32.mrf.mxu0 }
 0x15e   : > { %v542_v5 = vmax.f32 %v540_v2, 0.0  ;;  %v533_v7 = vadd.f32 %v528_v9, %v434_v1  ;;  %v668_v6 = vpop.f32.mrf.mxu1 }
 0x15f   : > { %v3100_v52 = vpop.f32.mrf.mxu0 }
 0x160   : > { %544 = vst.msk [vmem:[%s4078_s7] sm:$0xff] %vm279_vm3, %v542_v5  ;;  %v541_v8 = vadd.f32 %v4071_v57, %v533_v7  ;;  %v3108_v10 = vpop.f32.mrf.mxu1 }
 0x161   : > { %v720_v56 = vpop.f32.mrf.mxu0 }
 0x162   : > { %v543_v12 = vmax.f32 %v541_v8, 0.0  ;;  %v721_v13 = vadd.f32 %v720_v56, %v665_v45  ;;  %v814_v22 = vpop.f32.mrf.mxu1 }
 0x163   : > { %v3115_v16 = vpop.f32.mrf.mxu0 }
 0x164   : > { %546 = vst.msk [vmem:[%s4078_s7 + $0x8] sm:$0x3] %vm545_vm5, %v543_v12  ;;  %v821_v17 = vadd.f32 %v814_v22, %v721_v13  ;;  %v3123_v62 = vpop.f32.mrf.mxu1 }
 0x165   : > { %v723_v18 = vpop.f32.mrf.mxu0 }
 0x166   : > { %v823_v4 = vadd.f32 %v4071_v57, %v821_v17  ;;  %v724_v21 = vadd.f32 %v723_v18, %v668_v6  ;;  %v817_v24 = vpop.f32.mrf.mxu1 }
 0x167   : > { %v3116_v15 = vpop.f32.mrf.mxu0 }
 0x168   : > { %v825_v25 = vmax.f32 %v823_v4, 0.0  ;;  %v822_v26 = vadd.f32 %v817_v24, %v724_v21  ;;  %v3124_v36 = vpop.f32.mrf.mxu1 }
 0x169   : > { %v948_v27 = vpop.f32.mrf.mxu0 }
 0x16a   : > { %2772 = vst.msk [vmem:[%s4078_s7 + $0x10] sm:$0xff] %vm279_vm3, %v825_v25  ;;  %v824_v28 = vadd.f32 %v4071_v57, %v822_v26  ;;  %v1003_v29 = vpop.f32.mrf.mxu1 }
 0x16b   : > { %v3131_v31 = vpop.f32.mrf.mxu0  ;;  %v1004_v35 = vadd.f32 %v1003_v29, %v948_v27 }
 0x16c   : > { %v826_v11 = vmax.f32 %v824_v28, 0.0  ;;  %v3139_v19 = vpop.f32.mrf.mxu1 }
 0x16d   : > { %v951_v49 = vpop.f32.mrf.mxu0 }
 0x16e   : > { %2773 = vst.msk [vmem:[%s4078_s7 + $0x18] sm:$0x3] %vm545_vm5, %v826_v11  ;;  %v1006_v20 = vpop.f32.mrf.mxu1 }
 0x16f   : > { %v3132_v33 = vpop.f32.mrf.mxu0  ;;  %v1007_v40 = vadd.f32 %v1006_v20, %v951_v49 }
 0x170   : > { %v3140_v37 = vpop.f32.mrf.mxu1 }
 0x171   : > { %v1097_v38 = vpop.f32.mrf.mxu0 }
 0x172   : > { %v1104_v39 = vadd.f32 %v1097_v38, %v1004_v35  ;;  %v1231_v32 = vpop.f32.mrf.mxu1 }
 0x173   : > { %v3147_v23 = vpop.f32.mrf.mxu0 }
 0x174   : > { %v1106_v41 = vadd.f32 %v4071_v57, %v1104_v39  ;;  %v3155_v43 = vpop.f32.mrf.mxu1 }
 0x175   : > { %v1100_v61 = vpop.f32.mrf.mxu0 }
 0x176   : > { %v1108_v46 = vmax.f32 %v1106_v41, 0.0  ;;  %v1105_v47 = vadd.f32 %v1100_v61, %v1007_v40  ;;  %v1234_v30 = vpop.f32.mrf.mxu1 }
 0x177   : > { %v3148_v48 = vpop.f32.mrf.mxu0 }
 0x178   : > { %2810 = vst.msk [vmem:[%s4078_s7 + $0x20] sm:$0xff] %vm279_vm3, %v1108_v46  ;;  %v1107_v50 = vadd.f32 %v4071_v57, %v1105_v47  ;;  %v3156_v51 = vpop.f32.mrf.mxu1 }
 0x179   : > { %v1286_v14 = vpop.f32.mrf.mxu0 }
 0x17a   : > { %v1109_v44 = vmax.f32 %v1107_v50, 0.0  ;;  %v1287_v53 = vadd.f32 %v1286_v14, %v1231_v32  ;;  %v1380_v34 = vpop.f32.mrf.mxu1 }
 0x17b   : > { %v3163_v0 = vpop.f32.mrf.mxu0 }
 0x17c   : > { %2811 = vst.msk [vmem:[%s4078_s7 + $0x28] sm:$0x3] %vm545_vm5, %v1109_v44  ;;  %v1387_v54 = vadd.f32 %v1380_v34, %v1287_v53  ;;  %v3171_v55 = vpop.f32.mrf.mxu1 }
 0x17d   : > { %v1289_v42 = vpop.f32.mrf.mxu0 }
 0x17e   : > { %v1389_v58 = vadd.f32 %v4071_v57, %v1387_v54  ;;  %v1290_v59 = vadd.f32 %v1289_v42, %v1234_v30  ;;  %v1383_v60 = vpop.f32.mrf.mxu1 }
 0x17f   : > { %v3164_v45 = vpop.f32.mrf.mxu0 }
 0x180   : > { %v1391_v63 = vmax.f32 %v1389_v58, 0.0  ;;  %v1388_v1 = vadd.f32 %v1383_v60, %v1290_v59  ;;  %v3172_v2 = vpop.f32.mrf.mxu1 }
 0x181   : > { %v1514_v3 = vpop.f32.mrf.mxu0 }
 0x182   : > { %2848 = vst.msk [vmem:[%s4078_s7 + $0x30] sm:$0xff] %vm279_vm3, %v1391_v63  ;;  %v1390_v9 = vadd.f32 %v4071_v57, %v1388_v1  ;;  %v1569_v5 = vpop.f32.mrf.mxu1 }
 0x183   : > { %v3179_v7 = vpop.f32.mrf.mxu0  ;;  %v1570_v12 = vadd.f32 %v1569_v5, %v1514_v3 }
 0x184   : > { %v1392_v6 = vmax.f32 %v1390_v9, 0.0  ;;  %v3187_v52 = vpop.f32.mrf.mxu1 }
 0x185   : > { %v1517_v8 = vpop.f32.mrf.mxu0 }
 0x186   : > { %2849 = vst.msk [vmem:[%s4078_s7 + $0x38] sm:$0x3] %vm545_vm5, %v1392_v6  ;;  %v1572_v10 = vpop.f32.mrf.mxu1 }
 0x187   : > { %v3180_v56 = vpop.f32.mrf.mxu0  ;;  %v1573_v18 = vadd.f32 %v1572_v10, %v1517_v8 }
 0x188   : > { %v3188_v13 = vpop.f32.mrf.mxu1 }
 0x189   : > { %v1663_v22 = vpop.f32.mrf.mxu0 }
 0x18a   : > { %v1670_v16 = vadd.f32 %v1663_v22, %v1570_v12  ;;  %v1797_v17 = vpop.f32.mrf.mxu1 }
 0x18b   : > { %v3195_v62 = vpop.f32.mrf.mxu0 }
 0x18c   : > { %v1672_v4 = vadd.f32 %v4071_v57, %v1670_v16  ;;  %v3203_v21 = vpop.f32.mrf.mxu1 }
 0x18d   : > { %v1666_v24 = vpop.f32.mrf.mxu0 }
 0x18e   : > { %v1674_v15 = vmax.f32 %v1672_v4, 0.0  ;;  %v1671_v25 = vadd.f32 %v1666_v24, %v1573_v18  ;;  %v1800_v26 = vpop.f32.mrf.mxu1 }
 0x18f   : > { %v3196_v36 = vpop.f32.mrf.mxu0 }
 0x190   : > { %2886 = vst.msk [vmem:[%s4078_s7 + $0x40] sm:$0xff] %vm279_vm3, %v1674_v15  ;;  %v1673_v27 = vadd.f32 %v4071_v57, %v1671_v25  ;;  %v3204_v28 = vpop.f32.mrf.mxu1 }
 0x191   : > { %v1852_v29 = vpop.f32.mrf.mxu0 }
 0x192   : > { %v1675_v31 = vmax.f32 %v1673_v27, 0.0  ;;  %v1853_v11 = vadd.f32 %v1852_v29, %v1797_v17  ;;  %v1946_v19 = vpop.f32.mrf.mxu1 }
 0x193   : > { %v3211_v49 = vpop.f32.mrf.mxu0 }
 0x194   : > { %2887 = vst.msk [vmem:[%s4078_s7 + $0x48] sm:$0x3] %vm545_vm5, %v1675_v31  ;;  %v1953_v20 = vadd.f32 %v1946_v19, %v1853_v11  ;;  %v3219_v33 = vpop.f32.mrf.mxu1 }
 0x195   : > { %v1855_v35 = vpop.f32.mrf.mxu0 }
 0x196   : > { %v1955_v37 = vadd.f32 %v4071_v57, %v1953_v20  ;;  %v1856_v38 = vadd.f32 %v1855_v35, %v1800_v26  ;;  %v1949_v39 = vpop.f32.mrf.mxu1 }
 0x197   : > { %v3212_v32 = vpop.f32.mrf.mxu0 }
 0x198   : > { %v1957_v23 = vmax.f32 %v1955_v37, 0.0  ;;  %v1954_v40 = vadd.f32 %v1949_v39, %v1856_v38  ;;  %v3220_v41 = vpop.f32.mrf.mxu1 }
 0x199   : > { %v2080_v43 = vpop.f32.mrf.mxu0 }
 0x19a   : > { %2924 = vst.msk [vmem:[%s4078_s7 + $0x50] sm:$0xff] %vm279_vm3, %v1957_v23  ;;  %v1956_v61 = vadd.f32 %v4071_v57, %v1954_v40  ;;  %v2135_v46 = vpop.f32.mrf.mxu1 }
 0x19b   : > { %v3227_v47 = vpop.f32.mrf.mxu0  ;;  %v2136_v44 = vadd.f32 %v2135_v46, %v2080_v43 }
 0x19c   : > { %v1958_v30 = vmax.f32 %v1956_v61, 0.0  ;;  %v3235_v48 = vpop.f32.mrf.mxu1 }
 0x19d   : > { %v2083_v50 = vpop.f32.mrf.mxu0 }
 0x19e   : > { %2925 = vst.msk [vmem:[%s4078_s7 + $0x58] sm:$0x3] %vm545_vm5, %v1958_v30  ;;  %v2138_v51 = vpop.f32.mrf.mxu1 }
 0x19f   : > { %v3228_v14 = vpop.f32.mrf.mxu0  ;;  %v2139_v42 = vadd.f32 %v2138_v51, %v2083_v50 }
 0x1a0   : > { %v3236_v53 = vpop.f32.mrf.mxu1 }
 0x1a1   : > { %v2229_v34 = vpop.f32.mrf.mxu0 }
 0x1a2   : > { %v2236_v0 = vadd.f32 %v2229_v34, %v2136_v44  ;;  %v2363_v54 = vpop.f32.mrf.mxu1 }
 0x1a3   : > { %v3243_v55 = vpop.f32.mrf.mxu0 }
 0x1a4   : > { %v2238_v58 = vadd.f32 %v4071_v57, %v2236_v0  ;;  %v3251_v59 = vpop.f32.mrf.mxu1 }
 0x1a5   : > { %v2232_v60 = vpop.f32.mrf.mxu0 }
 0x1a6   : > { %v2240_v45 = vmax.f32 %v2238_v58, 0.0  ;;  %v2237_v63 = vadd.f32 %v2232_v60, %v2139_v42  ;;  %v2366_v1 = vpop.f32.mrf.mxu1 }
 0x1a7   : > { %v3244_v2 = vpop.f32.mrf.mxu0 }
 0x1a8   : > { %2962 = vst.msk [vmem:[%s4078_s7 + $0x60] sm:$0xff] %vm279_vm3, %v2240_v45  ;;  %v2239_v3 = vadd.f32 %v4071_v57, %v2237_v63  ;;  %v3252_v9 = vpop.f32.mrf.mxu1 }
 0x1a9   : > { %v2418_v5 = vpop.f32.mrf.mxu0 }
 0x1aa   : > { %v2241_v7 = vmax.f32 %v2239_v3, 0.0  ;;  %v2419_v6 = vadd.f32 %v2418_v5, %v2363_v54  ;;  %v2512_v52 = vpop.f32.mrf.mxu1 }
 0x1ab   : > { %v3259_v8 = vpop.f32.mrf.mxu0 }
 0x1ac   : > { %2963 = vst.msk [vmem:[%s4078_s7 + $0x68] sm:$0x3] %vm545_vm5, %v2241_v7  ;;  %v2519_v10 = vadd.f32 %v2512_v52, %v2419_v6  ;;  %v3267_v56 = vpop.f32.mrf.mxu1 }
 0x1ad   : > { %v2421_v12 = vpop.f32.mrf.mxu0 }
 0x1ae   : > { %v2521_v13 = vadd.f32 %v4071_v57, %v2519_v10  ;;  %v2422_v22 = vadd.f32 %v2421_v12, %v2366_v1  ;;  %v2515_v16 = vpop.f32.mrf.mxu1 }
 0x1af   : > { %v3260_v17 = vpop.f32.mrf.mxu0 }
 0x1b0   : > { %v2523_v62 = vmax.f32 %v2521_v13, 0.0  ;;  %v2520_v18 = vadd.f32 %v2515_v16, %v2422_v22  ;;  %v3268_v4 = vpop.f32.mrf.mxu1 }
 0x1b2   : > { %3000 = vst.msk [vmem:[%s4078_s7 + $0x70] sm:$0xff] %vm279_vm3, %v2523_v62  ;;  %v2522_v21 = vadd.f32 %v4071_v57, %v2520_v18 }
 0x1b4   : > { %v2524_v24 = vmax.f32 %v2522_v21, 0.0 }
 0x1b6   : > { %3001 = vst.msk [vmem:[%s4078_s7 + $0x78] sm:$0x3] %vm545_vm5, %v2524_v24 }
 0x1b7 PF: > { %s13_s14 = sadd.s32 1, %s3440_s14   ;;  %s4140_s12 = smov %s3436_s13 }
 0x1b8   : > { %p10_p5 = scmp.ge.s32.totalorder %s13_s14, 4   ;;  %s4141_s13 = smov %s4143_s15 }
 0x1ba   :  { %12 = sbr.rel (!%p10_p5) target bundleno = 2 (0x2), region = 87 }

</bundles_post_ra>
